<compile_context>
chip_gen: v6e
topology: v6e:2x2x1
jax: 0.10.0
libtpu: 0.0.40
codegen_flags: <defaults>
</compile_context>

<pallas_src>
import math
import jax
import jax.numpy as jnp
from jax import lax
from jax.experimental import pallas as pl
from jax.experimental.pallas import tpu as pltpu


def _srra_kernel(idx_ref,   # scalar-prefetch (SMEM); used only by index_maps
                 x_ref,     # (tm, tk)   bf16
                 w_ref,     # (tn, tk)   bf16   shared base weight tile
                 t_ref,     # (tm, rank) bf16   precomputed x @ B_idx^T tile
                 a_ref,     # (rank, tn) bf16   selected layer's A^T tile
                 bias_ref,  # (1, tn)    f32    selected layer's bias tile
                 o_ref,     # (tm, tn)   out dtype
                 acc_ref):  # VMEM (tm, tn) f32 accumulator
    k = pl.program_id(2)

    # Main term: x (tm,tk) . W (tn,tk), contracting the D_in axes of both
    # operands (weight stays in its native (D_out, D_in) layout).
    partial = lax.dot_general(
        x_ref[...], w_ref[...],
        dimension_numbers=(((1,), (1,)), ((), ())),
        preferred_element_type=jnp.float32)

    @pl.when(k == 0)
    def _first():
        acc_ref[...] = partial          # direct write: no zero-init pass

    @pl.when(k > 0)
    def _accumulate():
        acc_ref[...] += partial

    @pl.when(k == pl.num_programs(2) - 1)
    def _finalize():
        # Low-rank expansion: (tm, rank) . (rank, tn); bias added once per tile.
        low = lax.dot_general(
            t_ref[...], a_ref[...],
            dimension_numbers=(((1,), (0,)), ((), ())),
            preferred_element_type=jnp.float32)
        o_ref[...] = (acc_ref[...] + low + bias_ref[...]).astype(o_ref.dtype)


def _pick_tile(dim, target, step):
    """Largest multiple of `step` <= target that divides dim, else full extent."""
    if dim <= target:
        return dim                       # full-extent block is always legal
    c = (target // step) * step
    while c >= step:
        if dim % c == 0:
            return c
        c -= step
    # TODO(synk): pad+mask path for dims not divisible by 128; full-extent
    # fallback can exceed v7x's 64 MiB VMEM for very large ragged dims.
    return dim


def _shrink_tile(dim, cur, step):
    if cur <= step or cur >= dim:
        return cur
    cand = _pick_tile(dim, max(cur // 2, step), step)
    return cand if cand < cur else cur


def _vmem_estimate(tm, tn, tk, rank, in_isz, out_isz):
    pad8 = lambda v: -(-v // 8) * 8
    pad128 = lambda v: -(-v // 128) * 128
    tiles = (pad8(tm) * pad128(tk) * in_isz        # x
             + pad8(tn) * pad128(tk) * in_isz      # W
             + pad8(tm) * pad128(rank) * in_isz    # t
             + pad8(rank) * pad128(tn) * in_isz    # A^T
             + pad8(1) * pad128(tn) * 4            # bias (f32)
             + pad8(tm) * pad128(tn) * out_isz)    # out
    return 2 * tiles + tm * tn * 4                 # double-buffered I/O + f32 acc


def srra_forward(x, weight, A_all, B_all, bias_all, idx, *,
                 tm=256, tn=256, tk=512, compute_dtype=jnp.bfloat16):
    """Pallas forward for Shared_Residual_Representation_Aligner.

    x        : (N, D_in)
    weight   : (D_out, D_in)    shared base weight (torch.nn.Linear layout)
    A_all    : (L, D_out, rank) per-layer A
    B_all    : (L, rank, D_in)  per-layer B
    bias_all : (L, D_out)       per-layer bias
    idx      : layer index (python int or traced int scalar)
    """
    N, D_in = x.shape
    D_out = weight.shape[0]
    L, _, rank = A_all.shape
    out_dtype = x.dtype

    in_isz = jnp.dtype(compute_dtype).itemsize
    out_isz = jnp.dtype(out_dtype).itemsize

    # ---- tile selection (256-multiples feed the 256-wide v6e/v7x MXU) ----
    tm = _pick_tile(N, tm, 128)
    tn = _pick_tile(D_out, tn, 128)
    tk = _pick_tile(D_in, tk, 128)

    # Megacore (v7x has 2 TensorCores): keep >= 2 blocks on a parallel axis if
    # both M and D_out would otherwise collapse to a single tile each.
    if N == tm and D_out == tn and tn >= 256 and tn % 256 == 0:
        tn //= 2

    # VMEM budget: conservative 48 MiB so the double-buffered tiles also fit
    # v7x's 64 MiB physical VMEM (v5e/v6e have 128 MiB headroom).
    VMEM_BUDGET = 48 << 20
    for _ in range(16):
        if _vmem_estimate(tm, tn, tk, rank, in_isz, out_isz) <= VMEM_BUDGET:
            break
        new_tk = _shrink_tile(D_in, tk, 128)
        new_tn = _shrink_tile(D_out, tn, 128)
        new_tm = _shrink_tile(N, tm, 128)
        if new_tk < tk:
            tk = new_tk
        elif new_tn < tn:
            tn = new_tn
        elif new_tm < tm:
            tm = new_tm
        else:
            break
    est_vmem = _vmem_estimate(tm, tn, tk, rank, in_isz, out_isz)
    vmem_limit = int(min(max(est_vmem * 3 // 2, 32 << 20), 56 << 20))

    grid = (N // tm, D_out // tn, D_in // tk)

    # ---- operand preparation (layout plumbing + bf16 cast, one-time) ----
    idx_clamped = jnp.clip(jnp.asarray(idx, dtype=jnp.int32), 0, L - 1)
    idx_arr = jnp.reshape(idx_clamped, (1,))

    x_c = x.astype(compute_dtype)
    w_c = weight.astype(compute_dtype)
    a_t = jnp.swapaxes(A_all, 1, 2).astype(compute_dtype)        # (L, rank, D_out)
    bias3d = bias_all.reshape(L, 1, D_out).astype(jnp.float32)   # lane-dense rows

    # Low-rank projection hoisted out of the grid: t = x @ B_idx^T  (N, rank).
    b_sel = lax.dynamic_index_in_dim(B_all, idx_clamped, axis=0, keepdims=False)
    t_c = jnp.dot(x_c, b_sel.astype(compute_dtype).T,
                  preferred_element_type=jnp.float32).astype(compute_dtype)

    grid_spec = pltpu.PrefetchScalarGridSpec(
        num_scalar_prefetch=1,
        grid=grid,
        in_specs=[
            # x tile
            pl.BlockSpec((tm, tk), lambda i, j, k, idx_ref: (i, k)),
            # shared weight tile (native (D_out, D_in) layout)
            pl.BlockSpec((tn, tk), lambda i, j, k, idx_ref: (j, k)),
            # hoisted projection tile: (N, rank) -> (tm, rank)
            pl.BlockSpec((tm, rank), lambda i, j, k, idx_ref: (i, 0)),
            # selected layer's A^T tile: (L, rank, D_out) -> (rank, tn)
            pl.BlockSpec((None, rank, tn),
                         lambda i, j, k, idx_ref: (idx_ref[0], 0, j)),
            # selected layer's bias tile: (L, 1, D_out) -> (1, tn)
            pl.BlockSpec((None, 1, tn),
                         lambda i, j, k, idx_ref: (idx_ref[0], 0, j)),
        ],
        out_specs=pl.BlockSpec((tm, tn), lambda i, j, k, idx_ref: (i, j)),
        scratch_shapes=[pltpu.VMEM((tm, tn), jnp.float32)],
    )

    cost = pl.CostEstimate(
        flops=2 * N * D_out * D_in + 2 * N * rank * D_out,
        transcendentals=0,
        bytes_accessed=(N * D_in * in_isz + D_out * D_in * in_isz
                        + N * rank * in_isz + rank * D_out * in_isz
                        + D_out * 4 + N * D_out * out_isz))

    return pl.pallas_call(
        _srra_kernel,
        grid_spec=grid_spec,
        out_shape=jax.ShapeDtypeStruct((N, D_out), out_dtype),
        compiler_params=pltpu.CompilerParams(
            # M / D_out axes are independent -> megacore-shardable; K is the
            # reduction -> arbitrary, innermost.
            dimension_semantics=("parallel", "parallel", "arbitrary"),
            vmem_limit_bytes=vmem_limit,
        ),
        cost_estimate=cost,
    )(idx_arr, x_c, w_c, t_c, a_t, bias3d)


def init_params(key, num_layers, d_out, d_in, rank):
    """Deterministic synthetic parameters matching the module's shapes.

    (PyTorch init: A ~ kaiming_uniform, B = zeros, bias copied from the base
     linear.  Small random B/bias are used so the low-rank + bias paths are
     actually exercised; shapes/semantics are identical.)
    """
    kw, ka, kb, kbias = jax.random.split(key, 4)
    weight = jax.random.normal(kw, (d_out, d_in), jnp.float32) * 0.05
    bound_a = 1.0 / math.sqrt(rank)
    A_all = jax.random.uniform(ka, (num_layers, d_out, rank), jnp.float32,
                               minval=-bound_a, maxval=bound_a)
    B_all = jax.random.normal(kb, (num_layers, rank, d_in), jnp.float32) * 0.05
    bias_all = jax.random.normal(kbias, (num_layers, d_out), jnp.float32) * 0.05
    return weight, A_all, B_all, bias_all


if __name__ == "__main__":
    key = jax.random.PRNGKey(0)
    k_x, k_p = jax.random.split(key)

    # Tile-friendly but small shapes: (tm, tn, tk) = (256, 256, 512) gives a
    # real (2, 2, 2) grid with an actual K reduction and 2 parallel blocks.
    N, D_IN, D_OUT, RANK, NUM_LAYERS = 512, 1024, 512, 4, 3
    IDX = 1

    x = jax.random.normal(k_x, (N, D_IN), jnp.float32)
    weight, A_all, B_all, bias_all = init_params(k_p, NUM_LAYERS, D_OUT, D_IN, RANK)

    out = srra_forward(x, weight, A_all, B_all, bias_all, IDX)
    out = jax.block_until_ready(out)

    # Pure-JAX f32 reference (same math as F.linear(x, W + A@B, bias)).
    w_eff = weight + A_all[IDX] @ B_all[IDX]
    ref = x @ w_eff.T + bias_all[IDX][None, :]

    assert out.shape == (N, D_OUT)
    # Relative Frobenius error: tolerance accounts for bf16 operand rounding
    # (f32 accumulation) and the tiled summation order.
    rel_err = jnp.linalg.norm(out.astype(jnp.float32) - ref) / jnp.linalg.norm(ref)
    assert float(rel_err) < 2.5e-2, f"mismatch vs reference: rel_err={float(rel_err)}"

    print("KERNEL_OK")
</pallas_src>

<mosaic_0001>
module attributes {stable_mosaic.version = 11 : i64} {
  func.func @_srra_kernel(%arg0: i32, %arg1: i32, %arg2: i32, %arg3: memref<1xi32, #tpu.memory_space<smem>>, %arg4: memref<256x512xbf16, #tpu.memory_space<vmem>>, %arg5: memref<256x512xbf16, #tpu.memory_space<vmem>>, %arg6: memref<256x4xbf16, #tpu.memory_space<vmem>>, %arg7: memref<1x4x256xbf16, #tpu.memory_space<vmem>>, %arg8: memref<1x1x256xf32, #tpu.memory_space<vmem>>, %arg9: memref<256x256xf32, #tpu.memory_space<vmem>>, %arg10: memref<256x256xf32, #tpu.memory_space<vmem>>) attributes {dimension_semantics = [#tpu.dimension_semantics<parallel>, #tpu.dimension_semantics<parallel>, #tpu.dimension_semantics<arbitrary>], iteration_bounds = array<i64: 2, 2, 2>, scalar_prefetch = 1 : i64, scratch_operands = 1 : i64, tpu.core_type = #tpu.core_type<tc>, window_params = [{transform_indices = @transform_0, window_bounds = array<i64: 256, 512>}, {transform_indices = @transform_1, window_bounds = array<i64: 256, 512>}, {transform_indices = @transform_2, window_bounds = array<i64: 256, 4>}, {transform_indices = @transform_3, window_bounds = array<i64: 1, 4, 256>}, {transform_indices = @transform_4, window_bounds = array<i64: 1, 1, 256>}, {transform_indices = @transform_5, window_bounds = array<i64: 256, 256>}]} {
    %c0 = arith.constant 0 : index
    %c0_0 = arith.constant 0 : index
    %0 = vector.load %arg4[%c0, %c0_0] : memref<256x512xbf16, #tpu.memory_space<vmem>>, vector<256x512xbf16>
    %c0_1 = arith.constant 0 : index
    %c0_2 = arith.constant 0 : index
    %1 = vector.load %arg5[%c0_1, %c0_2] : memref<256x512xbf16, #tpu.memory_space<vmem>>, vector<256x512xbf16>
    %cst = arith.constant dense<0.000000e+00> : vector<256x256xf32>
    %2 = tpu.matmul %0, %1, %cst {dimension_numbers = #tpu.dot_dimension_numbers<[1], [1], [0], [0], [0, 0, 1, 0], [], []>} : vector<256x512xbf16>, vector<256x512xbf16>, vector<256x256xf32> -> vector<256x256xf32>
    %c0_i32 = arith.constant 0 : i32
    %3 = arith.cmpi eq, %arg2, %c0_i32 : i32
    %4 = arith.extui %3 : i1 to i32
    %c0_i32_3 = arith.constant 0 : i32
    %5 = arith.cmpi ne, %4, %c0_i32_3 : i32
    scf.if %5 {
      %c0_7 = arith.constant 0 : index
      %c0_8 = arith.constant 0 : index
      %12 = vector.load %arg10[%c0_7, %c0_8] : memref<256x256xf32, #tpu.memory_space<vmem>>, vector<256x256xf32>
      tpu.vector_store %arg10[%c0_7, %c0_8], %2 {strides = array<i32>} : memref<256x256xf32, #tpu.memory_space<vmem>>, vector<256x256xf32>,
    } else {
    }
    %c0_i32_4 = arith.constant 0 : i32
    %6 = arith.cmpi sgt, %arg2, %c0_i32_4 : i32
    %7 = arith.extui %6 : i1 to i32
    %c0_i32_5 = arith.constant 0 : i32
    %8 = arith.cmpi ne, %7, %c0_i32_5 : i32
    scf.if %8 {
      %c0_7 = arith.constant 0 : index
      %c0_8 = arith.constant 0 : index
      %12 = vector.load %arg10[%c0_7, %c0_8] : memref<256x256xf32, #tpu.memory_space<vmem>>, vector<256x256xf32>
      %13 = arith.addf %12, %2 : vector<256x256xf32>
      %c0_9 = arith.constant 0 : index
      %c0_10 = arith.constant 0 : index
      %14 = vector.load %arg10[%c0_9, %c0_10] : memref<256x256xf32, #tpu.memory_space<vmem>>, vector<256x256xf32>
      tpu.vector_store %arg10[%c0_9, %c0_10], %13 {strides = array<i32>} : memref<256x256xf32, #tpu.memory_space<vmem>>, vector<256x256xf32>,
    } else {
    }
    %c1_i32 = arith.constant 1 : i32
    %9 = arith.cmpi eq, %arg2, %c1_i32 : i32
    %10 = arith.extui %9 : i1 to i32
    %c0_i32_6 = arith.constant 0 : i32
    %11 = arith.cmpi ne, %10, %c0_i32_6 : i32
    scf.if %11 {
      %c0_7 = arith.constant 0 : index
      %c0_8 = arith.constant 0 : index
      %12 = vector.load %arg6[%c0_7, %c0_8] : memref<256x4xbf16, #tpu.memory_space<vmem>>, vector<256x4xbf16>
      %c0_9 = arith.constant 0 : index
      %c0_10 = arith.constant 0 : index
      %c0_11 = arith.constant 0 : index
      %13 = vector.load %arg7[%c0_9, %c0_10, %c0_11] : memref<1x4x256xbf16, #tpu.memory_space<vmem>>, vector<1x4x256xbf16>
      %14 = vector.shape_cast %13 : vector<1x4x256xbf16> to vector<4x256xbf16>
      %cst_12 = arith.constant dense<0.000000e+00> : vector<256x256xf32>
      %15 = tpu.matmul %12, %14, %cst_12 {dimension_numbers = #tpu.dot_dimension_numbers<[1], [0], [0], [1], [0, 0, 1, 1], [], []>} : vector<256x4xbf16>, vector<4x256xbf16>, vector<256x256xf32> -> vector<256x256xf32>
      %c0_13 = arith.constant 0 : index
      %c0_14 = arith.constant 0 : index
      %16 = vector.load %arg10[%c0_13, %c0_14] : memref<256x256xf32, #tpu.memory_space<vmem>>, vector<256x256xf32>
      %17 = arith.addf %16, %15 : vector<256x256xf32>
      %c0_15 = arith.constant 0 : index
      %c0_16 = arith.constant 0 : index
      %c0_17 = arith.constant 0 : index
      %18 = vector.load %arg8[%c0_15, %c0_16, %c0_17] : memref<1x1x256xf32, #tpu.memory_space<vmem>>, vector<1x1x256xf32>
      %19 = vector.shape_cast %18 : vector<1x1x256xf32> to vector<1x256xf32>
      %20 = vector.broadcast %19 : vector<1x256xf32> to vector<256x256xf32>
      %21 = arith.addf %17, %20 : vector<256x256xf32>
      %c0_18 = arith.constant 0 : index
      %c0_19 = arith.constant 0 : index
      %22 = vector.load %arg9[%c0_18, %c0_19] : memref<256x256xf32, #tpu.memory_space<vmem>>, vector<256x256xf32>
      tpu.vector_store %arg9[%c0_18, %c0_19], %21 {strides = array<i32>} : memref<256x256xf32, #tpu.memory_space<vmem>>, vector<256x256xf32>,
    } else {
    }
    return
  }
  func.func @transform_0(%arg0: i32, %arg1: i32, %arg2: i32, %arg3: memref<1xi32, #tpu.memory_space<smem>>) -> (i32, i32) {
    %c0_i32 = arith.constant 0 : i32
    return %arg0, %arg2 : i32, i32
  }
  func.func @transform_1(%arg0: i32, %arg1: i32, %arg2: i32, %arg3: memref<1xi32, #tpu.memory_space<smem>>) -> (i32, i32) {
    %c0_i32 = arith.constant 0 : i32
    return %arg1, %arg2 : i32, i32
  }
  func.func @transform_2(%arg0: i32, %arg1: i32, %arg2: i32, %arg3: memref<1xi32, #tpu.memory_space<smem>>) -> (i32, i32) {
    %c0_i32 = arith.constant 0 : i32
    %c0_i32_0 = arith.constant 0 : i32
    return %arg0, %c0_i32 : i32, i32
  }
  func.func @transform_3(%arg0: i32, %arg1: i32, %arg2: i32, %arg3: memref<1xi32, #tpu.memory_space<smem>>) -> (i32, i32, i32) {
    %c0 = arith.constant 0 : index
    %0 = memref.load %arg3[%c0] : memref<1xi32, #tpu.memory_space<smem>>
    %c0_i32 = arith.constant 0 : i32
    %c0_i32_0 = arith.constant 0 : i32
    return %0, %c0_i32, %arg1 : i32, i32, i32
  }
  func.func @transform_4(%arg0: i32, %arg1: i32, %arg2: i32, %arg3: memref<1xi32, #tpu.memory_space<smem>>) -> (i32, i32, i32) {
    %c0 = arith.constant 0 : index
    %0 = memref.load %arg3[%c0] : memref<1xi32, #tpu.memory_space<smem>>
    %c0_i32 = arith.constant 0 : i32
    %c0_i32_0 = arith.constant 0 : i32
    return %0, %c0_i32, %arg1 : i32, i32, i32
  }
  func.func @transform_5(%arg0: i32, %arg1: i32, %arg2: i32, %arg3: memref<1xi32, #tpu.memory_space<smem>>) -> (i32, i32) {
    %c0_i32 = arith.constant 0 : i32
    return %arg0, %arg1 : i32, i32
  }
}

</mosaic_0001>

<bundles_post_ra>
// kernel: tpu_custom_call.1
= control target key start
LH: loop header
LB: loop body
LE: loop exit
PB: predicated region body
PF: predicated region fallthrough
CT: control target
= control target key end

     0   :  { %s4437_s0 = inlined_call_operand.<no memory space> [shape: s32[1], index: 0, kind: input, shape index: {}]   ;;  %s4438_s1 = inlined_call_operand.hbm [shape: bf16[512,1024], index: 1, kind: input, shape index: {}]   ;;  %s4439_s2 = inlined_call_operand.hbm [shape: bf16[512,1024], index: 2, kind: input, shape index: {}]   ;;  %s4440_s3 = inlined_call_operand.vmem [shape: bf16[512,4], index: 3, kind: input, shape index: {}]   ;;  %s4441_s4 = inlined_call_operand.vmem [shape: bf16[3,4,512], index: 4, kind: input, shape index: {}]   ;;  %s4442_s5 = inlined_call_operand.vmem [shape: f32[3,1,512], index: 5, kind: input, shape index: {}]   ;;  %s4443_s6 = inlined_call_operand.hbm [shape: f32[512,512], index: 6, kind: output, shape index: {}]  }
   0x1   :  { %4465 = sst [smem:[#allocation39_spill]] %s4438_s1 }
   0x2   :  { %4466 = sst [smem:[#allocation40_spill]] %s4439_s2 }
   0x3   :  { %4467 = sst [smem:[#allocation41_spill]] %s4440_s3 }
   0x4   :  { %4468 = sst [smem:[#allocation42_spill]] %s4441_s4 }
   0x5   :  { %4469 = sst [smem:[#allocation43_spill]] %s4442_s5 }
   0x6   :  { %4470 = sst [smem:[#allocation44_spill]] %s4443_s6 }
   0x7   :  { %11 = sst [smem:[#allocation4]] %s4437_s0 }
   0x8   :  { %12 = vsyncpa [#allocation6], 0 }
   0x9   :  { %14 = vsyncpa [#allocation6 + $0x1], 0 }
   0xa   :  { %15 = vsyncpa [#allocation9], 0 }
   0xb   :  { %17 = vsyncpa [#allocation9 + $0x1], 0 }
   0xc   :  { %18 = vsyncpa [#allocation7], 0 }
   0xd   :  { %20 = vsyncpa [#allocation7 + $0x1], 0  ;;  %s3507_s23 = smov 0   ;;  %s3509_s24 = smov 0  }
   0xe   :  { %s3511_s25 = smov 0   ;;  %s3513_s26 = smov 0  }
   0xf   :  { %s3515_s27 = smov 0   ;;  %s3517_s28 = smov 0  }
  0x10   :  { %s3519_s29 = smov 0   ;;  %s3521_s0 = smov 0  }
  0x11   :  { %s3523_s30 = smov 0   ;;  %s3525_s7 = smov 0  }
  0x12   :  { %s3527_s8 = smov 0   ;;  %s3529_s9 = smov 0  }
  0x13   :  { %s3531_s10 = smov 0   ;;  %s3533_s11 = smov 0  }
  0x14   :  { %s3535_s12 = smov 0   ;;  %s3537_s13 = smov 0  }
  0x15 LB: > { %4471 = sst [smem:[#allocation14_spill]] %s3425_s0  ;;  %s2673_s14 = sadd.s32 4294967295, %s3457_s13   ;;  %s3457_s13 = sphi %s3537_s13, %s26_s13   ;;  %s3453_s12 = sphi %s3535_s12, %s4564_s12   ;;  %s3449_s11 = sphi %s3533_s11, %s4563_s11   ;;  %s3445_s10 = sphi %s3531_s10, %s4577_s10   ;;  %s3441_s9 = sphi %s3529_s9, %s4576_s9   ;;  %s3437_s8 = sphi %s3527_s8, %s4560_s8   ;;  %s3433_s7 = sphi %s3525_s7, %s4575_s7   ;;  %s3429_s30 = sphi %s3523_s30, %s4574_s30   ;;  %s3425_s0 = sphi %s3521_s0, %s4573_s0   ;;  %s3421_s29 = sphi %s3519_s29, %s4572_s29   ;;  %s3417_s28 = sphi %s3517_s28, %s4571_s28   ;;  %s3413_s27 = sphi %s3515_s27, %s4570_s27   ;;  %s3409_s26 = sphi %s3513_s26, %s4569_s26   ;;  %s3405_s25 = sphi %s3511_s25, %s4568_s25   ;;  %s3401_s24 = sphi %s3509_s24, %s4567_s24   ;;  %s3397_s23 = sphi %s3507_s23, %s4565_s23  }
  0x16   : > { %4472 = sst [smem:[#allocation15_spill]] %s3433_s7  ;;  %s38_s15 = sadd.s32 1, %s3445_s10 }
  0x17   : > { %4473 = sst [smem:[#allocation16_spill]] %s3437_s8  ;;  %p3587_p0 = scmp.ge.s32.totalorder %s38_s15, 2 }
  0x18   : > { %4474 = sst [smem:[#allocation17_spill]] %s3441_s9  ;;  %p61_p1 = scmp.ne.s32.totalorder %s3429_s30, %s3425_s0 }
  0x19   : > { %4475 = sst [smem:[#allocation18_spill]] %s3449_s11  ;;  %s4579_s15 = smov (%p3587_p0, %s38_s15), 0 }
  0x1a   : > { %4476 = sst [smem:[#allocation19_spill]] %s3453_s12  ;;  %p4450_p2 = scmp.eq.s32.totalorder %s3457_s13, 0 }
  0x1b   : > { %4478 = sst [smem:[#allocation20_spill]] %s4579_s15  ;;  %p67_p3 = scmp.ne.s32.totalorder %s3425_s0, %s3421_s29 }
  0x1c   : > { %s3603_s19 = ssub.s32 %s3445_s10, %s4579_s15  ;;  %p3605_p4 = scmp.eq.s32.totalorder %s2673_s14, 0 }
  0x1d   : > { %p3611_p5 = por %p4450_p2, %p61_p1  ;;  %p3615_p6 = scmp.eq.s32.totalorder %s2673_s14, 7 }
  0x1e   : > { %p3621_p7 = por %p3605_p4, %p67_p3  ;;  %p4449_p8 = scmp.lt.s32.totalorder %s3457_s13, 8 }
  0x1f   : > { %s233_s18 = sand.u32 1, %s3429_s30   ;;  %s4454_s15 = sshll.u32 %s3445_s10, 2 }
  0x20   : > { %s4482_s29 = scalar_select %p3621_p7, 1, 0 }
  0x21   : > { %s2677_s17 = sshll.u32 %s233_s18, 9  ;;  %s2870_s6 = sshll.u32 %s3453_s12, 8 }
  0x22   : > { %4483 = sst [smem:[#allocation21_spill]] %s4482_s29  ;;  %s237_s7 = scalar_lea.vmem [#allocation5], %s2677_s17 }
  0x23   : > { %s247_s4 = sshll.u32 %s237_s7, 4  ;;  %s244_s5 = sadd.s32 %s2870_s6, %s4454_s15  ;;  %s248_s4 = int_to_ptr.vmem [resolvable:$true] %s247_s4 }
  0x24   : > { %s2681_s3 = sshll.u32 %s244_s5, 6  ;;  %p3635_p9 = pnand %p4449_p8, %p3611_p5 }
  0x25   : > { %s4485_s1 = sld [smem:[#allocation39_spill]]  ;;  %p2687_p10 = scmp.ge.s32.totalorder %s3457_s13, 1 }
  0x26   : > { %s234_s0 = scalar_lea.sflag [#allocation6], %s233_s18  ;;  %p3239_p11 = pneg %p3635_p9 }
  0x27   : > { %s3250_s7 = scalar_lea.vmem %s248_s4, 8192  ;;  %s3459_s5 = smov [#allocation5]  }
  0x28   : > { %p3251_p12 = scmp.ne.s32.totalorder %s248_s4, %s3250_s7  ;;  %s3255_s6 = sshll.u32 %s3459_s5, 4  ;;  %s3256_s6 = int_to_ptr.vmem [resolvable:$false] %s3255_s6 }
  0x29   : > { %s3257_s17 = scalar_lea.vmem %s3256_s6, 16384  ;;  %p3258_p3 = scmp.lt.s32.totalorder %s248_s4, %s3256_s6 }
  0x2a   : > { %p3253_p13 = pnand %p3251_p12, %p3239_p11  ;;  %p3259_p5 = scmp.lt.s32.totalorder %s3257_s17, %s3250_s7 }
  0x2b   : > { %s246_s29 = scalar_lea.hbm %s4485_s1, %s2681_s3 }
  0x2c   : > { %p3254_p1 = pneg %p3253_p13  ;;  %p3260_p8 = por %p3259_p5, %p3258_p3 }
  0x2e   : > { %p3261_p2 = pnand %p3260_p8, %p3254_p1 }
  0x30   : > { %3264 = shalt.err (!%p3261_p2)
}
  0x31   : > { %s4451_s8 = smov 512   ;;  %s4452_s3 = smov 256  }
  0x32   : > { %s4453_s9 = smov 16   ;;  %p317_p2 = scmp.lt.s32.totalorder %s3457_s13, 9 }
  0x33   : > { %2884 = dma.hbm_to_vmem [thread:$0]  (!%p3635_p9), %s246_s29, 8192, %s248_s4, %s234_s0, %s4451_s8, %s4452_s3, %s4453_s9  }
  0x34   : > { %p3653_p8 = pnand %p2687_p10, %p317_p2  ;;  %s2674_s21 = sadd.s32 4294967294, %s3457_s13  }
  0x35   : > { %s41_s7 = sadd.s32 1, %s3449_s11  ;;  %s82_s14 = sadd.s32 1, %s3417_s28 }
  0x36   : > { %s4581_s7 = smov (!%p3587_p0, %s41_s7), %s3449_s11  ;;  %p89_p11 = scmp.ne.s32.totalorder %s3417_s28, %s3413_s27 }
  0x37   : > { %p43_p12 = scmp.ge.s32.totalorder %s4581_s7, 2  ;;  %p95_p9 = scmp.ne.s32.totalorder %s3413_s27, %s3409_s26 }
  0x38   : > { %p4487_p13 = scmp.eq.s32.totalorder %s3457_s13, 0  ;;  %s196_s0 = sadd.s32 1, %s3405_s25 }
  0x39   : > { %s4583_s7 = smov (%p43_p12, %s4581_s7), 0  ;;  %s4490_s29 = sadd.s32 1, %s3453_s12 }
  0x3a   : > { %p3669_p1 = por %p89_p11, %p4487_p13  ;;  %4489 = sst [smem:[#allocation22_spill]] %s4583_s7 }
  0x3b   : > { %s4585_s29 = smov (!%p43_p12, %s4490_s29), %s3453_s12  ;;  %s77_s16 = ssub.s32 %s3449_s11, %s4583_s7 }
  0x3c   : > { %p3683_p0 = por %p95_p9, %p3605_p4  ;;  %p47_p10 = scmp.ge.s32.totalorder %s4585_s29, 2 }
  0x3d   : > { %s79_s26 = sor.u32 %s77_s16, %s3603_s19  ;;  %p206_p5 = scmp.ne.s32.totalorder %s3405_s25, %s3401_s24 }
  0x3e   : > { %p80_p3 = scmp.eq.s32.totalorder %s79_s26, 0  ;;  %s4587_s29 = smov (%p47_p10, %s4585_s29), 0 }
  0x3f   : > { %4492 = sst [smem:[#allocation23_spill]] %s4587_s29  ;;  %s49_s20 = ssub.s32 %s3453_s12, %s4587_s29 }
  0x40   : > { %s3693_s6 = scalar_select %p80_p3, %s3417_s28, %s82_s14  }
  0x41   : > { %p3699_p2 = por %p3615_p6, %p206_p5  ;;  %s51_s8 = sor.u32 %s3603_s19, %s49_s20 }
  0x42   : > { %s193_s3 = sor.u32 %s77_s16, %s49_s20  ;;  %p52_p4 = scmp.eq.s32.totalorder %s51_s8, 0 }
  0x43   : > { %s4493_s17 = scalar_select %p3699_p2, 1, 0 }
  0x44   : > { %p194_p11 = scmp.eq.s32.totalorder %s193_s3, 0  ;;  %p212_p12 = scmp.ne.s32.totalorder %s3401_s24, %s3397_s23 }
  0x45   : > { %p213_p9 = scmp.eq.s32.totalorder %s2674_s21, 7  ;;  %s4494_s26 = sadd.s32 1, %s3429_s30 }
  0x46   : > { %s3709_s9 = scalar_select %p52_p4, %s3429_s30, %s4494_s26  }
  0x47   : > { %s3712_s15 = scalar_select %p194_p11, %s3405_s25, %s196_s0  }
  0x48   : > { %p3714_p13 = por %p213_p9, %p212_p12  ;;  %s257_s22 = sand.u32 1, %s3417_s28  }
  0x49   : > { %s2682_s1 = sshll.u32 %s257_s22, 9  ;;  %s2871_s29 = sshll.u32 %s3449_s11, 8 }
  0x4a   : > { %s4495_s14 = scalar_select %p3714_p13, 1, 0 }
  0x4b   : > { %s4496_s19 = sshll.u32 %s3445_s10, 2  ;;  %s261_s8 = scalar_lea.vmem [#allocation8], %s2682_s1 }
  0x4c   : > { %s268_s16 = sadd.s32 %s2871_s29, %s4496_s19  ;;  %s271_s20 = sshll.u32 %s261_s8, 4  ;;  %s272_s20 = int_to_ptr.vmem [resolvable:$true] %s271_s20 }
  0x4d   : > { %s2686_s7 = sshll.u32 %s268_s16, 6  ;;  %s4497_s2 = sld [smem:[#allocation40_spill]] }
  0x4e   : > { %p4498_p6 = scmp.lt.s32.totalorder %s3457_s13, 8  ;;  %s258_s12 = scalar_lea.sflag [#allocation9], %s257_s22 }
  0x4f   : > { %s3278_s11 = scalar_lea.vmem %s272_s20, 8192  ;;  %s3463_s1 = smov [#allocation8]  }
  0x50   : > { %p3729_p10 = pnand %p4498_p6, %p3669_p1  ;;  %p3279_p5 = scmp.ne.s32.totalorder %s272_s20, %s3278_s11 }
  0x51   : > { %s3283_s29 = sshll.u32 %s3463_s1, 4  ;;  %s3284_s29 = int_to_ptr.vmem [resolvable:$false] %s3283_s29 }
  0x52   : > { %p3267_p3 = pneg %p3729_p10  ;;  %s3285_s19 = scalar_lea.vmem %s3284_s29, 16384 }
  0x53   : > { %s270_s26 = scalar_lea.hbm %s4497_s2, %s2686_s7  ;;  %p3286_p12 = scmp.lt.s32.totalorder %s272_s20, %s3284_s29 }
  0x54   : > { %p3281_p4 = pnand %p3279_p5, %p3267_p3  ;;  %p3287_p9 = scmp.lt.s32.totalorder %s3285_s19, %s3278_s11 }
  0x56   : > { %p3282_p11 = pneg %p3281_p4  ;;  %p3288_p13 = por %p3287_p9, %p3286_p12 }
  0x58   : > { %p3289_p2 = pnand %p3288_p13, %p3282_p11 }
  0x5a   : > { %3292 = shalt.err (!%p3289_p2)
}
  0x5b   : > { %s4500_s7 = smov 16   ;;  %s4501_s4 = smov 256  }
  0x5c   : > { %s4502_s22 = smov 512   ;;  %321 = sbr.rel (%p3653_p8) target bundleno = 958 (0x3be), region = 40 }
  0x5d   : > { %2887 = dma.hbm_to_vmem [thread:$0]  (!%p3729_p10), %s270_s26, 8192, %s272_s20, %s258_s12, %s4502_s22, %s4501_s4, %s4500_s7  }
  0x61   : > { %s4503_s16 = sld [smem:[#allocation14_spill]] }
  0x67   : > { %s323_s3 = sand.u32 1, %s4503_s16  }
  0x68   : > { %s2688_s21 = sshll.u32 %s323_s3, 9  ;;  %s324_s1 = scalar_lea.sflag [#allocation6], %s323_s3 }
  0x69   : > { %s3743_s2 = scalar_lea.vmem [#allocation5], %s2688_s21 }
  0x6a   : > { %3384 = dma.done.wait (%p3621_p7), %s324_s1, 8192  }
  0x6b   : > { %3386 = vsyncadd (%p3621_p7), %s324_s1, 4294959104  ;;  %s332_s11 = sand.u32 1, %s3413_s27  }
  0x6c   : > { %s2689_s0 = sshll.u32 %s332_s11, 9  ;;  %s333_s12 = scalar_lea.sflag [#allocation9], %s332_s11 }
  0x6d   : > { %s3750_s20 = scalar_lea.vmem [#allocation8], %s2689_s0 }
  0x6e   : > { %3388 = dma.done.wait (%p3683_p0), %s333_s12, 8192  }
  0x6f   : > { %3390 = vsyncadd (%p3683_p0), %s333_s12, 4294959104  ;;  %s4505_s18 = sld [smem:[#allocation16_spill]]  ;;  %s389_s19 = sand.u32 1, %s3401_s24   ;;  %v3029_v0 = vld [vmem:[%s3750_s20 + $0xe4] ss:$16 sps:$4 sm:$0xff]  }
  0x70   : > { %s4506_s26 = sld [smem:[#allocation17_spill]]  ;;  %s3763_s4 = sshll.u32 %s389_s19, 9  ;;  %v3031_v1 = vld [vmem:[%s3750_s20 + $0xec] ss:$16 sps:$4 sm:$0xff]   ;;  %1196 = vmatprep.subr.bf16.mxu0 %v3029_v0  ;;  %v3033_v2 = vld [vmem:[%s3750_s20 + $0xe0] ss:$16 sps:$4 sm:$0xff]  }
  0x71   : > { %s402_s7 = sld [smem:[#allocation4]]  ;;  %v3034_v3 = vld [vmem:[%s3750_s20 + $0xe8] ss:$16 sps:$4 sm:$0xff]   ;;  %1389 = vmatprep.subr.bf16.mxu1 %v3031_v1  ;;  %v3035_v4 = vld [vmem:[%s3750_s20 + $0xc4] ss:$16 sps:$4 sm:$0xff]   ;;  %1197 = vmatpush1.bf16.xpose.msra.mxu0 %v3033_v2 }
  0x72   : > { %s4507_s21 = sld [smem:[#allocation41_spill]]  ;;  %1390 = vmatpush1.bf16.xpose.msra.mxu1 %v3034_v3  ;;  %v3037_v5 = vld [vmem:[%s3750_s20 + $0xcc] ss:$16 sps:$4 sm:$0xff]   ;;  %1198 = vmatprep.subr.bf16.mxu0 %v3035_v4  ;;  %v3039_v6 = vld [vmem:[%s3750_s20 + $0xc0] ss:$16 sps:$4 sm:$0xff]  }
  0x73   : > { %1391 = vmatprep.subr.bf16.mxu1 %v3037_v5  ;;  %s4509_s3 = sld [smem:[#allocation42_spill]]  ;;  %v3040_v7 = vld [vmem:[%s3750_s20 + $0xc8] ss:$16 sps:$4 sm:$0xff]   ;;  %v3041_v8 = vld [vmem:[%s3750_s20 + $0xa4] ss:$16 sps:$4 sm:$0xff]  }
  0x74   : > { %v3043_v9 = vld [vmem:[%s3750_s20 + $0xac] ss:$16 sps:$4 sm:$0xff]   ;;  %v3045_v10 = vld [vmem:[%s3750_s20 + $0xa0] ss:$16 sps:$4 sm:$0xff]   ;;  %v3046_v11 = vld [vmem:[%s3750_s20 + $0xa8] ss:$16 sps:$4 sm:$0xff]  }
  0x75   : > { %s3757_s29 = sshll.u32 %s4505_s18, 1  ;;  %v3047_v12 = vld [vmem:[%s3750_s20 + $0x84] ss:$16 sps:$4 sm:$0xff]   ;;  %v3049_v13 = vld [vmem:[%s3750_s20 + $0x8c] ss:$16 sps:$4 sm:$0xff]  }
  0x76   : > { %p406_p7 = scmp.lt.s32.totalorder %s3757_s29, 3  ;;  %s2691_s5 = sshll.u32 %s4506_s26, 5  ;;  %v3051_v14 = vld [vmem:[%s3750_s20 + $0x80] ss:$16 sps:$4 sm:$0xff]   ;;  %v3052_v15 = vld [vmem:[%s3750_s20 + $0x88] ss:$16 sps:$4 sm:$0xff]  }
  0x77   : > { %p397_p8 = scmp.lt.s32.totalorder %s2691_s5, 63  ;;  %p404_p1 = scmp.lt.s32.totalorder %s402_s7, 2  ;;  %v3053_v16 = vld [vmem:[%s3750_s20 + $0x64] ss:$16 sps:$4 sm:$0xff]   ;;  %v3055_v17 = vld [vmem:[%s3750_s20 + $0x6c] ss:$16 sps:$4 sm:$0xff]  }
  0x78   : > { %s407_s22 = scalar_select %p406_p7, %s3757_s29, 3  ;;  %v3057_v18 = vld [vmem:[%s3750_s20 + $0x60] ss:$16 sps:$4 sm:$0xff]   ;;  %v3058_v19 = vld [vmem:[%s3750_s20 + $0x68] ss:$16 sps:$4 sm:$0xff]  }
  0x79   : > { %s4589_s5 = smov (!%p397_p8, %s2691_s5), 63  ;;  %s4591_s7 = smov (!%p404_p1, %s402_s7), 2  ;;  %1199 = vmatpush1.bf16.xpose.msra.mxu0 %v3039_v6  ;;  %v3059_v20 = vld [vmem:[%s3750_s20 + $0x44] ss:$16 sps:$4 sm:$0xff]   ;;  %v3061_v21 = vld [vmem:[%s3750_s20 + $0x4c] ss:$16 sps:$4 sm:$0xff]  }
  0x7a   : > { %s2692_s16 = sshll.u32 %s4589_s5, 2  ;;  %s2694_s11 = sshll.u32 %s4591_s7, 2  ;;  %1392 = vmatpush1.bf16.xpose.msra.mxu1 %v3040_v7  ;;  %1200 = vmatprep.subr.bf16.mxu0 %v3041_v8  ;;  %v3063_v22 = vld [vmem:[%s3750_s20 + $0x40] ss:$16 sps:$4 sm:$0xff]   ;;  %v3064_v23 = vld [vmem:[%s3750_s20 + $0x48] ss:$16 sps:$4 sm:$0xff]  }
  0x7b   : > { %s3774_s1 = scalar_lea.vmem %s4507_s21, %s2692_s16  ;;  %s3778_s0 = sadd.s32 %s2694_s11, %s407_s22  ;;  %1393 = vmatprep.subr.bf16.mxu1 %v3043_v9  ;;  %v3065_v24 = vld [vmem:[%s3750_s20 + $0x24] ss:$16 sps:$4 sm:$0xff]   ;;  %v3067_v25 = vld [vmem:[%s3750_s20 + $0x2c] ss:$16 sps:$4 sm:$0xff]   ;;  %v3069_v28 = vld [vmem:[%s3750_s20 + $0x20] ss:$16 sps:$4 sm:$0xff]  }
  0x7c   : > { %s2695_s12 = sshll.u32 %s3778_s0, 1  ;;  %s4508_s5 = sld [smem:[#allocation43_spill]]  ;;  %v3127_v26 = vld [vmem:[%s3743_s2 + $0x4] ss:$16 sps:$4 sm:$0xff]   ;;  %v3130_v27 = vld [vmem:[%s3743_s2 + $0xc] ss:$16 sps:$4 sm:$0xff]  }
  0x7d   : > { %s3788_s21 = scalar_lea.vmem %s4509_s3, %s2695_s12  ;;  %1228 = vmatprep.mubr.bf16.mxu0 %v3127_v26  ;;  %v3070_v29 = vld [vmem:[%s3750_s20 + $0x28] ss:$16 sps:$4 sm:$0xff]   ;;  %1421 = vmatprep.mubr.bf16.mxu1 %v3130_v27  ;;  %v3071_v30 = vld [vmem:[%s3750_s20 + $0x4] ss:$16 sps:$4 sm:$0xff]   ;;  %v3073_v31 = vld [vmem:[%s3750_s20 + $0xc] ss:$16 sps:$4 sm:$0xff]  }
  0x7e   : > { %v3075_v32 = vld [vmem:[%s3750_s20] ss:$16 sps:$4 sm:$0xff]   ;;  %v3076_v33 = vld [vmem:[%s3750_s20 + $0x8] ss:$16 sps:$4 sm:$0xff]   ;;  %v3077_v34 = vld [vmem:[%s3750_s20 + $0x1e4] ss:$16 sps:$4 sm:$0xff]  }
  0x7f   : > { %v3079_v35 = vld [vmem:[%s3750_s20 + $0x1ec] ss:$16 sps:$4 sm:$0xff]   ;;  %v3081_v36 = vld [vmem:[%s3750_s20 + $0x1e0] ss:$16 sps:$4 sm:$0xff]   ;;  %v3082_v37 = vld [vmem:[%s3750_s20 + $0x1e8] ss:$16 sps:$4 sm:$0xff]  }
  0x80   : > { %v3083_v38 = vld [vmem:[%s3750_s20 + $0x1c4] ss:$16 sps:$4 sm:$0xff]   ;;  %v3085_v39 = vld [vmem:[%s3750_s20 + $0x1cc] ss:$16 sps:$4 sm:$0xff]   ;;  %v3087_v40 = vld [vmem:[%s3750_s20 + $0x1c0] ss:$16 sps:$4 sm:$0xff]  }
  0x81   : > { %1201 = vmatpush1.bf16.xpose.msra.mxu0 %v3045_v10  ;;  %v3088_v41 = vld [vmem:[%s3750_s20 + $0x1c8] ss:$16 sps:$4 sm:$0xff]   ;;  %v3089_v42 = vld [vmem:[%s3750_s20 + $0x1a4] ss:$16 sps:$4 sm:$0xff]   ;;  %v3091_v43 = vld [vmem:[%s3750_s20 + $0x1ac] ss:$16 sps:$4 sm:$0xff]  }
  0x82   : > { %s422_s16 = scalar_lea.vmem %s4508_s5, %s3778_s0  ;;  %1394 = vmatpush1.bf16.xpose.msra.mxu1 %v3046_v11  ;;  %1202 = vmatprep.subr.bf16.mxu0 %v3047_v12  ;;  %v3093_v44 = vld [vmem:[%s3750_s20 + $0x1a0] ss:$16 sps:$4 sm:$0xff]   ;;  %v3094_v45 = vld [vmem:[%s3750_s20 + $0x1a8] ss:$16 sps:$4 sm:$0xff]   ;;  %v3095_v46 = vld [vmem:[%s3750_s20 + $0x184] ss:$16 sps:$4 sm:$0xff]  }
  0x83   : > { %1395 = vmatprep.subr.bf16.mxu1 %v3049_v13  ;;  %v3097_v47 = vld [vmem:[%s3750_s20 + $0x18c] ss:$16 sps:$4 sm:$0xff]   ;;  %v3099_v48 = vld [vmem:[%s3750_s20 + $0x180] ss:$16 sps:$4 sm:$0xff]   ;;  %v3100_v49 = vld [vmem:[%s3750_s20 + $0x188] ss:$16 sps:$4 sm:$0xff]  }
  0x84   : > { %v3101_v50 = vld [vmem:[%s3750_s20 + $0x164] ss:$16 sps:$4 sm:$0xff]   ;;  %v3103_v51 = vld [vmem:[%s3750_s20 + $0x16c] ss:$16 sps:$4 sm:$0xff]   ;;  %v3105_v52 = vld [vmem:[%s3750_s20 + $0x160] ss:$16 sps:$4 sm:$0xff]  }
  0x85   : > { %v3106_v53 = vld [vmem:[%s3750_s20 + $0x168] ss:$16 sps:$4 sm:$0xff]   ;;  %v3107_v54 = vld [vmem:[%s3750_s20 + $0x144] ss:$16 sps:$4 sm:$0xff]   ;;  %v3109_v55 = vld [vmem:[%s3750_s20 + $0x14c] ss:$16 sps:$4 sm:$0xff]  }
  0x86   : > { %v3111_v56 = vld [vmem:[%s3750_s20 + $0x140] ss:$16 sps:$4 sm:$0xff]   ;;  %v3112_v57 = vld [vmem:[%s3750_s20 + $0x148] ss:$16 sps:$4 sm:$0xff]   ;;  %v3113_v58 = vld [vmem:[%s3750_s20 + $0x124] ss:$16 sps:$4 sm:$0xff]  }
  0x87   : > { %v3115_v59 = vld [vmem:[%s3750_s20 + $0x12c] ss:$16 sps:$4 sm:$0xff]   ;;  %v3117_v60 = vld [vmem:[%s3750_s20 + $0x120] ss:$16 sps:$4 sm:$0xff]   ;;  %v3118_v61 = vld [vmem:[%s3750_s20 + $0x128] ss:$16 sps:$4 sm:$0xff]  }
  0x88   : > { %v3119_v62 = vld [vmem:[%s3750_s20 + $0x104] ss:$16 sps:$4 sm:$0xff]   ;;  %v3121_v63 = vld [vmem:[%s3750_s20 + $0x10c] ss:$16 sps:$4 sm:$0xff]   ;;  %v3123_v0 = vld [vmem:[%s3750_s20 + $0x100] ss:$16 sps:$4 sm:$0xff]  }
  0x89   : > { %1203 = vmatpush1.bf16.xpose.msra.mxu0 %v3051_v14  ;;  %v3124_v1 = vld [vmem:[%s3750_s20 + $0x108] ss:$16 sps:$4 sm:$0xff]   ;;  %v3125_v2 = vld [vmem:[%s3743_s2] ss:$16 sps:$4 sm:$0xff]   ;;  %v3131_v4 = vld [vmem:[%s3743_s2 + $0x24] ss:$16 sps:$4 sm:$0xff]  }
  0x8a   : > { %1396 = vmatpush1.bf16.xpose.msra.mxu1 %v3052_v15  ;;  %1204 = vmatprep.subr.bf16.mxu0 %v3053_v16  ;;  %v3128_v3 = vld [vmem:[%s3743_s2 + $0x8] ss:$16 sps:$4 sm:$0xff]   ;;  %v3133_v5 = vld [vmem:[%s3743_s2 + $0x2c] ss:$16 sps:$4 sm:$0xff]   ;;  %v3135_v6 = vld [vmem:[%s3743_s2 + $0x20] ss:$16 sps:$4 sm:$0xff]  }
  0x8b   : > { %1397 = vmatprep.subr.bf16.mxu1 %v3055_v17  ;;  %v3136_v7 = vld [vmem:[%s3743_s2 + $0x28] ss:$16 sps:$4 sm:$0xff]   ;;  %v3137_v8 = vld [vmem:[%s3743_s2 + $0x44] ss:$16 sps:$4 sm:$0xff]   ;;  %v3139_v9 = vld [vmem:[%s3743_s2 + $0x4c] ss:$16 sps:$4 sm:$0xff]  }
  0x8c   : > { %v3141_v10 = vld [vmem:[%s3743_s2 + $0x40] ss:$16 sps:$4 sm:$0xff]   ;;  %v3142_v11 = vld [vmem:[%s3743_s2 + $0x48] ss:$16 sps:$4 sm:$0xff]   ;;  %v3143_v12 = vld [vmem:[%s3743_s2 + $0x64] ss:$16 sps:$4 sm:$0xff]  }
  0x8d   : > { %v3145_v13 = vld [vmem:[%s3743_s2 + $0x6c] ss:$16 sps:$4 sm:$0xff]   ;;  %v3147_v14 = vld [vmem:[%s3743_s2 + $0x60] ss:$16 sps:$4 sm:$0xff]   ;;  %v3148_v15 = vld [vmem:[%s3743_s2 + $0x68] ss:$16 sps:$4 sm:$0xff]  }
  0x8e   : > { %v3149_v16 = vld [vmem:[%s3743_s2 + $0x84] ss:$16 sps:$4 sm:$0xff]   ;;  %v3151_v17 = vld [vmem:[%s3743_s2 + $0x8c] ss:$16 sps:$4 sm:$0xff]   ;;  %v3165_v26 = vld [vmem:[%s3743_s2 + $0xc0] ss:$16 sps:$4 sm:$0xff]  }
  0x8f   : > { %v3166_v27 = vld [vmem:[%s3743_s2 + $0xc8] ss:$16 sps:$4 sm:$0xff]   ;;  %s4525_s20 = sld [smem:[#allocation15_spill]] }
  0x91   : > { %1205 = vmatpush1.bf16.xpose.msra.mxu0 %v3057_v18  ;;  %v3153_v18 = vld [vmem:[%s3743_s2 + $0x80] ss:$16 sps:$4 sm:$0xff]  }
  0x92   : > { %1398 = vmatpush1.bf16.xpose.msra.mxu1 %v3058_v19  ;;  %1206 = vmatprep.subr.bf16.mxu0 %v3059_v20  ;;  %v3154_v19 = vld [vmem:[%s3743_s2 + $0x88] ss:$16 sps:$4 sm:$0xff]   ;;  %v3155_v20 = vld [vmem:[%s3743_s2 + $0xa4] ss:$16 sps:$4 sm:$0xff]  }
  0x93   : > { %1399 = vmatprep.subr.bf16.mxu1 %v3061_v21  ;;  %v3157_v21 = vld [vmem:[%s3743_s2 + $0xac] ss:$16 sps:$4 sm:$0xff]  }
  0x95   : > { %p2826_p0 = scmp.ne.s32.totalorder %s4525_s20, 0 }
  0x99   : > { %1207 = vmatpush1.bf16.xpose.msra.mxu0 %v3063_v22  ;;  %v3159_v22 = vld [vmem:[%s3743_s2 + $0xa0] ss:$16 sps:$4 sm:$0xff]  }
  0x9a   : > { %1400 = vmatpush1.bf16.xpose.msra.mxu1 %v3064_v23  ;;  %1208 = vmatprep.subr.bf16.mxu0 %v3065_v24  ;;  %v3160_v23 = vld [vmem:[%s3743_s2 + $0xa8] ss:$16 sps:$4 sm:$0xff]   ;;  %v3161_v24 = vld [vmem:[%s3743_s2 + $0xc4] ss:$16 sps:$4 sm:$0xff]  }
  0x9b   : > { %1401 = vmatprep.subr.bf16.mxu1 %v3067_v25  ;;  %v3163_v25 = vld [vmem:[%s3743_s2 + $0xcc] ss:$16 sps:$4 sm:$0xff]  }
  0xa1   : > { %1209 = vmatpush1.bf16.xpose.msra.mxu0 %v3069_v28  ;;  %v3167_v28 = vld [vmem:[%s3743_s2 + $0xe4] ss:$16 sps:$4 sm:$0xff]  }
  0xa2   : > { %1402 = vmatpush1.bf16.xpose.msra.mxu1 %v3070_v29  ;;  %1210 = vmatprep.subr.bf16.mxu0 %v3071_v30  ;;  %v3169_v29 = vld [vmem:[%s3743_s2 + $0xec] ss:$16 sps:$4 sm:$0xff]   ;;  %v3171_v30 = vld [vmem:[%s3743_s2 + $0xe0] ss:$16 sps:$4 sm:$0xff]  }
  0xa3   : > { %1403 = vmatprep.subr.bf16.mxu1 %v3073_v31  ;;  %v3172_v31 = vld [vmem:[%s3743_s2 + $0xe8] ss:$16 sps:$4 sm:$0xff]  }
  0xa9   : > { %1211 = vmatpush1.bf16.xpose.msra.mxu0 %v3075_v32  ;;  %v3173_v32 = vld [vmem:[%s3743_s2 + $0x104] ss:$16 sps:$4 sm:$0xff]  }
  0xaa   : > { %1404 = vmatpush1.bf16.xpose.msra.mxu1 %v3076_v33  ;;  %1212 = vmatprep.subr.bf16.mxu0 %v3077_v34  ;;  %v3175_v33 = vld [vmem:[%s3743_s2 + $0x10c] ss:$16 sps:$4 sm:$0xff]   ;;  %v3177_v34 = vld [vmem:[%s3743_s2 + $0x100] ss:$16 sps:$4 sm:$0xff]  }
  0xab   : > { %1405 = vmatprep.subr.bf16.mxu1 %v3079_v35  ;;  %v3178_v35 = vld [vmem:[%s3743_s2 + $0x108] ss:$16 sps:$4 sm:$0xff]  }
  0xb1   : > { %1213 = vmatpush2.bf16.xpose.msra.mxu0 %v3081_v36  ;;  %v3179_v36 = vld [vmem:[%s3743_s2 + $0x124] ss:$16 sps:$4 sm:$0xff]  }
  0xb2   : > { %1406 = vmatpush2.bf16.xpose.msra.mxu1 %v3082_v37  ;;  %1214 = vmatprep.subr.bf16.mxu0 %v3083_v38  ;;  %v3181_v37 = vld [vmem:[%s3743_s2 + $0x12c] ss:$16 sps:$4 sm:$0xff]   ;;  %v3183_v38 = vld [vmem:[%s3743_s2 + $0x120] ss:$16 sps:$4 sm:$0xff]  }
  0xb3   : > { %1407 = vmatprep.subr.bf16.mxu1 %v3085_v39  ;;  %v3184_v39 = vld [vmem:[%s3743_s2 + $0x128] ss:$16 sps:$4 sm:$0xff]  }
  0xb9   : > { %1215 = vmatpush2.bf16.xpose.msra.mxu0 %v3087_v40  ;;  %v3185_v40 = vld [vmem:[%s3743_s2 + $0x144] ss:$16 sps:$4 sm:$0xff]  }
  0xba   : > { %1408 = vmatpush2.bf16.xpose.msra.mxu1 %v3088_v41  ;;  %1216 = vmatprep.subr.bf16.mxu0 %v3089_v42  ;;  %v3187_v41 = vld [vmem:[%s3743_s2 + $0x14c] ss:$16 sps:$4 sm:$0xff]   ;;  %v3189_v42 = vld [vmem:[%s3743_s2 + $0x140] ss:$16 sps:$4 sm:$0xff]  }
  0xbb   : > { %1409 = vmatprep.subr.bf16.mxu1 %v3091_v43  ;;  %v3190_v43 = vld [vmem:[%s3743_s2 + $0x148] ss:$16 sps:$4 sm:$0xff]  }
  0xc1   : > { %1217 = vmatpush2.bf16.xpose.msra.mxu0 %v3093_v44  ;;  %v3191_v44 = vld [vmem:[%s3743_s2 + $0x164] ss:$16 sps:$4 sm:$0xff]  }
  0xc2   : > { %1410 = vmatpush2.bf16.xpose.msra.mxu1 %v3094_v45  ;;  %1218 = vmatprep.subr.bf16.mxu0 %v3095_v46  ;;  %v3193_v45 = vld [vmem:[%s3743_s2 + $0x16c] ss:$16 sps:$4 sm:$0xff]   ;;  %v3195_v46 = vld [vmem:[%s3743_s2 + $0x160] ss:$16 sps:$4 sm:$0xff]  }
  0xc3   : > { %1411 = vmatprep.subr.bf16.mxu1 %v3097_v47  ;;  %v3196_v47 = vld [vmem:[%s3743_s2 + $0x168] ss:$16 sps:$4 sm:$0xff]  }
  0xc9   : > { %1219 = vmatpush2.bf16.xpose.msra.mxu0 %v3099_v48  ;;  %v3197_v48 = vld [vmem:[%s3743_s2 + $0x184] ss:$16 sps:$4 sm:$0xff]  }
  0xca   : > { %1412 = vmatpush2.bf16.xpose.msra.mxu1 %v3100_v49  ;;  %1220 = vmatprep.subr.bf16.mxu0 %v3101_v50  ;;  %v3199_v49 = vld [vmem:[%s3743_s2 + $0x18c] ss:$16 sps:$4 sm:$0xff]   ;;  %v3201_v50 = vld [vmem:[%s3743_s2 + $0x180] ss:$16 sps:$4 sm:$0xff]  }
  0xcb   : > { %1413 = vmatprep.subr.bf16.mxu1 %v3103_v51  ;;  %v3202_v51 = vld [vmem:[%s3743_s2 + $0x188] ss:$16 sps:$4 sm:$0xff]  }
  0xd1   : > { %1221 = vmatpush2.bf16.xpose.msra.mxu0 %v3105_v52  ;;  %v3203_v52 = vld [vmem:[%s3743_s2 + $0x1a4] ss:$16 sps:$4 sm:$0xff]  }
  0xd2   : > { %1414 = vmatpush2.bf16.xpose.msra.mxu1 %v3106_v53  ;;  %1222 = vmatprep.subr.bf16.mxu0 %v3107_v54  ;;  %v3205_v53 = vld [vmem:[%s3743_s2 + $0x1ac] ss:$16 sps:$4 sm:$0xff]   ;;  %v3207_v54 = vld [vmem:[%s3743_s2 + $0x1a0] ss:$16 sps:$4 sm:$0xff]  }
  0xd3   : > { %1415 = vmatprep.subr.bf16.mxu1 %v3109_v55  ;;  %v3208_v55 = vld [vmem:[%s3743_s2 + $0x1a8] ss:$16 sps:$4 sm:$0xff]  }
  0xd9   : > { %1223 = vmatpush2.bf16.xpose.msra.mxu0 %v3111_v56  ;;  %v3209_v56 = vld [vmem:[%s3743_s2 + $0x1c4] ss:$16 sps:$4 sm:$0xff]  }
  0xda   : > { %1416 = vmatpush2.bf16.xpose.msra.mxu1 %v3112_v57  ;;  %1224 = vmatprep.subr.bf16.mxu0 %v3113_v58  ;;  %v3211_v57 = vld [vmem:[%s3743_s2 + $0x1cc] ss:$16 sps:$4 sm:$0xff]   ;;  %v3213_v58 = vld [vmem:[%s3743_s2 + $0x1c0] ss:$16 sps:$4 sm:$0xff]  }
  0xdb   : > { %1417 = vmatprep.subr.bf16.mxu1 %v3115_v59  ;;  %v3214_v59 = vld [vmem:[%s3743_s2 + $0x1c8] ss:$16 sps:$4 sm:$0xff]  }
  0xe1   : > { %1225 = vmatpush2.bf16.xpose.msra.mxu0 %v3117_v60  ;;  %v3215_v60 = vld [vmem:[%s3743_s2 + $0x1e4] ss:$16 sps:$4 sm:$0xff]  }
  0xe2   : > { %1418 = vmatpush2.bf16.xpose.msra.mxu1 %v3118_v61  ;;  %1226 = vmatprep.subr.bf16.mxu0 %v3119_v62  ;;  %v3217_v61 = vld [vmem:[%s3743_s2 + $0x1ec] ss:$16 sps:$4 sm:$0xff]   ;;  %v3219_v62 = vld [vmem:[%s3743_s2 + $0x1e0] ss:$16 sps:$4 sm:$0xff]  }
  0xe3   : > { %1419 = vmatprep.subr.bf16.mxu1 %v3121_v63  ;;  %v3220_v63 = vld [vmem:[%s3743_s2 + $0x1e8] ss:$16 sps:$4 sm:$0xff]   ;;  %s4041_s2 = scalar_lea.vmem [#allocation10], %s3763_s4 }
  0xe9   : > { %1227 = vmatpush2.bf16.xpose.msra.mxu0 %v3123_v0 }
  0xea   : > { %1420 = vmatpush2.bf16.xpose.msra.mxu1 %v3124_v1 }
  0xf0   : > { %1229 = vmatmul.mubr.bf16.vlgmr.msra.gmra.mxu0 %v3125_v2 }
  0xf1   : > { %1422 = vmatmul.mubr.bf16.vlgmr.msra.gmra.mxu1 %v3128_v3  ;;  %1238 = vmatprep.mubr.bf16.mxu0 %v3131_v4 }
  0xf2   : > { %1431 = vmatprep.mubr.bf16.mxu1 %v3133_v5 }
  0xf8   : > { %1239 = vmatmul.mubr.bf16.gmra.mxu0 %v3135_v6 }
  0xf9   : > { %1432 = vmatmul.mubr.bf16.gmra.mxu1 %v3136_v7  ;;  %1248 = vmatprep.mubr.bf16.mxu0 %v3137_v8 }
  0xfa   : > { %1441 = vmatprep.mubr.bf16.mxu1 %v3139_v9 }
 0x100   : > { %1249 = vmatmul.mubr.bf16.gmra.mxu0 %v3141_v10 }
 0x101   : > { %1442 = vmatmul.mubr.bf16.gmra.mxu1 %v3142_v11  ;;  %1258 = vmatprep.mubr.bf16.mxu0 %v3143_v12 }
 0x102   : > { %1451 = vmatprep.mubr.bf16.mxu1 %v3145_v13 }
 0x108   : > { %1259 = vmatmul.mubr.bf16.gmra.mxu0 %v3147_v14 }
 0x109   : > { %1452 = vmatmul.mubr.bf16.gmra.mxu1 %v3148_v15  ;;  %1268 = vmatprep.mubr.bf16.mxu0 %v3149_v16 }
 0x10a   : > { %1461 = vmatprep.mubr.bf16.mxu1 %v3151_v17 }
 0x110   : > { %1269 = vmatmul.mubr.bf16.gmra.mxu0 %v3153_v18 }
 0x111   : > { %1462 = vmatmul.mubr.bf16.gmra.mxu1 %v3154_v19  ;;  %1278 = vmatprep.mubr.bf16.mxu0 %v3155_v20 }
 0x112   : > { %1471 = vmatprep.mubr.bf16.mxu1 %v3157_v21 }
 0x118   : > { %1279 = vmatmul.mubr.bf16.gmra.mxu0 %v3159_v22 }
 0x119   : > { %1472 = vmatmul.mubr.bf16.gmra.mxu1 %v3160_v23  ;;  %1288 = vmatprep.mubr.bf16.mxu0 %v3161_v24 }
 0x11a   : > { %1481 = vmatprep.mubr.bf16.mxu1 %v3163_v25 }
 0x120   : > { %1289 = vmatmul.mubr.bf16.gmra.mxu0 %v3165_v26 }
 0x121   : > { %1482 = vmatmul.mubr.bf16.gmra.mxu1 %v3166_v27  ;;  %1298 = vmatprep.mubr.bf16.mxu0 %v3167_v28 }
 0x122   : > { %1491 = vmatprep.mubr.bf16.mxu1 %v3169_v29 }
 0x128   : > { %1299 = vmatmul.mubr.bf16.gmra.mxu0 %v3171_v30 }
 0x129   : > { %1492 = vmatmul.mubr.bf16.gmra.mxu1 %v3172_v31  ;;  %1308 = vmatprep.mubr.bf16.mxu0 %v3173_v32 }
 0x12a   : > { %1501 = vmatprep.mubr.bf16.mxu1 %v3175_v33 }
 0x130   : > { %1309 = vmatmul.mubr.bf16.gmra.mxu0 %v3177_v34 }
 0x131   : > { %1502 = vmatmul.mubr.bf16.gmra.mxu1 %v3178_v35  ;;  %1318 = vmatprep.mubr.bf16.mxu0 %v3179_v36 }
 0x132   : > { %1511 = vmatprep.mubr.bf16.mxu1 %v3181_v37 }
 0x138   : > { %1319 = vmatmul.mubr.bf16.gmra.mxu0 %v3183_v38 }
 0x139   : > { %1512 = vmatmul.mubr.bf16.gmra.mxu1 %v3184_v39  ;;  %1328 = vmatprep.mubr.bf16.mxu0 %v3185_v40 }
 0x13a   : > { %1521 = vmatprep.mubr.bf16.mxu1 %v3187_v41 }
 0x140   : > { %1329 = vmatmul.mubr.bf16.gmra.mxu0 %v3189_v42 }
 0x141   : > { %1522 = vmatmul.mubr.bf16.gmra.mxu1 %v3190_v43  ;;  %1338 = vmatprep.mubr.bf16.mxu0 %v3191_v44 }
 0x142   : > { %1531 = vmatprep.mubr.bf16.mxu1 %v3193_v45 }
 0x148   : > { %1339 = vmatmul.mubr.bf16.gmra.mxu0 %v3195_v46 }
 0x149   : > { %1532 = vmatmul.mubr.bf16.gmra.mxu1 %v3196_v47  ;;  %1348 = vmatprep.mubr.bf16.mxu0 %v3197_v48 }
 0x14a   : > { %1541 = vmatprep.mubr.bf16.mxu1 %v3199_v49 }
 0x150   : > { %1349 = vmatmul.mubr.bf16.gmra.mxu0 %v3201_v50 }
 0x151   : > { %1542 = vmatmul.mubr.bf16.gmra.mxu1 %v3202_v51  ;;  %1358 = vmatprep.mubr.bf16.mxu0 %v3203_v52 }
 0x152   : > { %1551 = vmatprep.mubr.bf16.mxu1 %v3205_v53 }
 0x158   : > { %1359 = vmatmul.mubr.bf16.gmra.mxu0 %v3207_v54 }
 0x159   : > { %1552 = vmatmul.mubr.bf16.gmra.mxu1 %v3208_v55  ;;  %1368 = vmatprep.mubr.bf16.mxu0 %v3209_v56 }
 0x15a   : > { %1561 = vmatprep.mubr.bf16.mxu1 %v3211_v57 }
 0x160   : > { %1369 = vmatmul.mubr.bf16.gmra.mxu0 %v3213_v58 }
 0x161   : > { %1562 = vmatmul.mubr.bf16.gmra.mxu1 %v3214_v59  ;;  %1378 = vmatprep.mubr.bf16.mxu0 %v3215_v60 }
 0x162   : > { %1571 = vmatprep.mubr.bf16.mxu1 %v3217_v61 }
 0x168   : > { %1379 = vmatmul.mubr.bf16.gmra.mxu0 %v3219_v62 }
 0x169   : > { %1572 = vmatmul.mubr.bf16.gmra.mxu1 %v3220_v63 }
 0x1b0   : > { %v1230_v0 = vpop.f32.mrf.mxu0 }
 0x1b1   : > { %v1423_v1 = vpop.f32.mrf.mxu1 }
 0x1b2   : > { %v3912_v2 = vadd.f32 %v1423_v1, %v1230_v0  ;;  %v1232_v3 = vpop.f32.mrf.mxu0 }
 0x1b3   : > { %v1425_v4 = vpop.f32.mrf.mxu1 }
 0x1b4   : > { %v3914_v5 = vadd.f32 %v1425_v4, %v1232_v3  ;;  %v1234_v6 = vpop.f32.mrf.mxu0 }
 0x1b5   : > { %v1427_v7 = vpop.f32.mrf.mxu1 }
 0x1b6   : > { %v3916_v8 = vadd.f32 %v1427_v7, %v1234_v6  ;;  %v1236_v9 = vpop.f32.mrf.mxu0 }
 0x1b7   : > { %v1429_v10 = vpop.f32.mrf.mxu1 }
 0x1b8   : > { %v3918_v11 = vadd.f32 %v1429_v10, %v1236_v9  ;;  %v1240_v12 = vpop.f32.mrf.mxu0 }
 0x1b9   : > { %v1433_v13 = vpop.f32.mrf.mxu1 }
 0x1ba   : > { %v3920_v14 = vadd.f32 %v1433_v13, %v1240_v12  ;;  %v1242_v15 = vpop.f32.mrf.mxu0 }
 0x1bb   : > { %v1435_v16 = vpop.f32.mrf.mxu1 }
 0x1bc   : > { %v3922_v17 = vadd.f32 %v1435_v16, %v1242_v15  ;;  %v1244_v18 = vpop.f32.mrf.mxu0 }
 0x1bd   : > { %v1437_v19 = vpop.f32.mrf.mxu1 }
 0x1be   : > { %v3924_v20 = vadd.f32 %v1437_v19, %v1244_v18  ;;  %v1246_v21 = vpop.f32.mrf.mxu0 }
 0x1bf   : > { %v1439_v22 = vpop.f32.mrf.mxu1 }
 0x1c0   : > { %v3926_v23 = vadd.f32 %v1439_v22, %v1246_v21  ;;  %v1250_v24 = vpop.f32.mrf.mxu0 }
 0x1c1   : > { %v1443_v25 = vpop.f32.mrf.mxu1 }
 0x1c2   : > { %v3928_v26 = vadd.f32 %v1443_v25, %v1250_v24  ;;  %v1252_v27 = vpop.f32.mrf.mxu0 }
 0x1c3   : > { %v1445_v28 = vpop.f32.mrf.mxu1 }
 0x1c4   : > { %v3930_v29 = vadd.f32 %v1445_v28, %v1252_v27  ;;  %v1254_v30 = vpop.f32.mrf.mxu0 }
 0x1c5   : > { %v1447_v31 = vpop.f32.mrf.mxu1 }
 0x1c6   : > { %v3932_v32 = vadd.f32 %v1447_v31, %v1254_v30  ;;  %v1256_v33 = vpop.f32.mrf.mxu0 }
 0x1c7   : > { %v1449_v34 = vpop.f32.mrf.mxu1 }
 0x1c8   : > { %v3934_v35 = vadd.f32 %v1449_v34, %v1256_v33  ;;  %v1260_v36 = vpop.f32.mrf.mxu0 }
 0x1c9   : > { %v1453_v37 = vpop.f32.mrf.mxu1 }
 0x1ca   : > { %v3936_v38 = vadd.f32 %v1453_v37, %v1260_v36  ;;  %v1262_v39 = vpop.f32.mrf.mxu0 }
 0x1cb   : > { %v1455_v40 = vpop.f32.mrf.mxu1 }
 0x1cc   : > { %v3938_v41 = vadd.f32 %v1455_v40, %v1262_v39  ;;  %v1264_v42 = vpop.f32.mrf.mxu0 }
 0x1cd   : > { %v1457_v43 = vpop.f32.mrf.mxu1 }
 0x1ce   : > { %v3940_v44 = vadd.f32 %v1457_v43, %v1264_v42  ;;  %v1266_v45 = vpop.f32.mrf.mxu0 }
 0x1cf   : > { %v1459_v46 = vpop.f32.mrf.mxu1 }
 0x1d0   : > { %v3942_v47 = vadd.f32 %v1459_v46, %v1266_v45  ;;  %v1270_v48 = vpop.f32.mrf.mxu0 }
 0x1d1   : > { %v1463_v49 = vpop.f32.mrf.mxu1 }
 0x1d2   : > { %v3944_v50 = vadd.f32 %v1463_v49, %v1270_v48  ;;  %v1272_v51 = vpop.f32.mrf.mxu0 }
 0x1d3   : > { %v1465_v52 = vpop.f32.mrf.mxu1 }
 0x1d4   : > { %v3946_v53 = vadd.f32 %v1465_v52, %v1272_v51  ;;  %v1274_v54 = vpop.f32.mrf.mxu0 }
 0x1d5   : > { %v1467_v55 = vpop.f32.mrf.mxu1 }
 0x1d6   : > { %v3948_v56 = vadd.f32 %v1467_v55, %v1274_v54  ;;  %v1276_v57 = vpop.f32.mrf.mxu0 }
 0x1d7   : > { %v1469_v58 = vpop.f32.mrf.mxu1 }
 0x1d8   : > { %v3950_v59 = vadd.f32 %v1469_v58, %v1276_v57  ;;  %v1280_v60 = vpop.f32.mrf.mxu0 }
 0x1d9   : > { %v1473_v61 = vpop.f32.mrf.mxu1 }
 0x1da   : > { %v3952_v62 = vadd.f32 %v1473_v61, %v1280_v60  ;;  %v1282_v63 = vpop.f32.mrf.mxu0 }
 0x1db   : > { %v1475_v0 = vpop.f32.mrf.mxu1 }
 0x1dc   : > { %v3954_v1 = vadd.f32 %v1475_v0, %v1282_v63  ;;  %v1284_v3 = vpop.f32.mrf.mxu0 }
 0x1dd   : > { %v1477_v4 = vpop.f32.mrf.mxu1 }
 0x1de   : > { %v3956_v6 = vadd.f32 %v1477_v4, %v1284_v3  ;;  %v1286_v7 = vpop.f32.mrf.mxu0 }
 0x1df   : > { %v1479_v9 = vpop.f32.mrf.mxu1 }
 0x1e0   : > { %v3958_v10 = vadd.f32 %v1479_v9, %v1286_v7  ;;  %v1290_v12 = vpop.f32.mrf.mxu0 }
 0x1e1   : > { %v1483_v13 = vpop.f32.mrf.mxu1 }
 0x1e2   : > { %v3960_v15 = vadd.f32 %v1483_v13, %v1290_v12  ;;  %v1292_v16 = vpop.f32.mrf.mxu0 }
 0x1e3   : > { %v1485_v18 = vpop.f32.mrf.mxu1 }
 0x1e4   : > { %v3962_v19 = vadd.f32 %v1485_v18, %v1292_v16  ;;  %v1294_v21 = vpop.f32.mrf.mxu0 }
 0x1e5   : > { %v1487_v22 = vpop.f32.mrf.mxu1 }
 0x1e6   : > { %v3964_v24 = vadd.f32 %v1487_v22, %v1294_v21  ;;  %v1296_v25 = vpop.f32.mrf.mxu0 }
 0x1e7   : > { %v1489_v27 = vpop.f32.mrf.mxu1 }
 0x1e8   : > { %v3966_v28 = vadd.f32 %v1489_v27, %v1296_v25  ;;  %v1300_v30 = vpop.f32.mrf.mxu0 }
 0x1e9   : > { %v1493_v31 = vpop.f32.mrf.mxu1 }
 0x1ea   : > { %v3968_v33 = vadd.f32 %v1493_v31, %v1300_v30  ;;  %v1302_v34 = vpop.f32.mrf.mxu0 }
 0x1eb   : > { %v1495_v36 = vpop.f32.mrf.mxu1 }
 0x1ec   : > { %v3970_v37 = vadd.f32 %v1495_v36, %v1302_v34  ;;  %v1304_v39 = vpop.f32.mrf.mxu0 }
 0x1ed   : > { %v1497_v40 = vpop.f32.mrf.mxu1 }
 0x1ee   : > { %v3972_v42 = vadd.f32 %v1497_v40, %v1304_v39  ;;  %v1306_v43 = vpop.f32.mrf.mxu0 }
 0x1ef   : > { %v1499_v45 = vpop.f32.mrf.mxu1 }
 0x1f0   : > { %v3974_v46 = vadd.f32 %v1499_v45, %v1306_v43  ;;  %v1310_v48 = vpop.f32.mrf.mxu0 }
 0x1f1   : > { %v1503_v49 = vpop.f32.mrf.mxu1 }
 0x1f2   : > { %v3976_v51 = vadd.f32 %v1503_v49, %v1310_v48  ;;  %v1312_v52 = vpop.f32.mrf.mxu0 }
 0x1f3   : > { %v1505_v54 = vpop.f32.mrf.mxu1 }
 0x1f4   : > { %v3978_v55 = vadd.f32 %v1505_v54, %v1312_v52  ;;  %v1314_v57 = vpop.f32.mrf.mxu0 }
 0x1f5   : > { %v1507_v58 = vpop.f32.mrf.mxu1 }
 0x1f6   : > { %v3980_v60 = vadd.f32 %v1507_v58, %v1314_v57  ;;  %v1316_v61 = vpop.f32.mrf.mxu0 }
 0x1f7   : > { %v1509_v63 = vpop.f32.mrf.mxu1 }
 0x1f8   : > { %v3982_v0 = vadd.f32 %v1509_v63, %v1316_v61  ;;  %v1320_v3 = vpop.f32.mrf.mxu0 }
 0x1f9   : > { %v1513_v4 = vpop.f32.mrf.mxu1 }
 0x1fa   : > { %v3984_v7 = vadd.f32 %v1513_v4, %v1320_v3  ;;  %v1322_v9 = vpop.f32.mrf.mxu0 }
 0x1fb   : > { %v1515_v12 = vpop.f32.mrf.mxu1 }
 0x1fc   : > { %v3986_v13 = vadd.f32 %v1515_v12, %v1322_v9  ;;  %v1324_v16 = vpop.f32.mrf.mxu0 }
 0x1fd   : > { %v1517_v18 = vpop.f32.mrf.mxu1 }
 0x1fe   : > { %v3988_v21 = vadd.f32 %v1517_v18, %v1324_v16  ;;  %v1326_v22 = vpop.f32.mrf.mxu0 }
 0x1ff   : > { %v1519_v25 = vpop.f32.mrf.mxu1 }
 0x200   : > { %v3990_v27 = vadd.f32 %v1519_v25, %v1326_v22  ;;  %v1330_v30 = vpop.f32.mrf.mxu0 }
 0x201   : > { %v1523_v31 = vpop.f32.mrf.mxu1 }
 0x202   : > { %v3992_v34 = vadd.f32 %v1523_v31, %v1330_v30  ;;  %v1332_v36 = vpop.f32.mrf.mxu0 }
 0x203   : > { %v1525_v39 = vpop.f32.mrf.mxu1 }
 0x204   : > { %v3994_v40 = vadd.f32 %v1525_v39, %v1332_v36  ;;  %v1334_v43 = vpop.f32.mrf.mxu0 }
 0x205   : > { %v1527_v45 = vpop.f32.mrf.mxu1 }
 0x206   : > { %v3996_v48 = vadd.f32 %v1527_v45, %v1334_v43  ;;  %v1336_v49 = vpop.f32.mrf.mxu0 }
 0x207   : > { %v1529_v52 = vpop.f32.mrf.mxu1 }
 0x208   : > { %v3998_v54 = vadd.f32 %v1529_v52, %v1336_v49  ;;  %v1340_v57 = vpop.f32.mrf.mxu0 }
 0x209   : > { %v1533_v58 = vpop.f32.mrf.mxu1 }
 0x20a   : > { %v4000_v61 = vadd.f32 %v1533_v58, %v1340_v57  ;;  %v1342_v63 = vpop.f32.mrf.mxu0 }
 0x20b   : > { %v1535_v3 = vpop.f32.mrf.mxu1 }
 0x20c   : > { %v4002_v4 = vadd.f32 %v1535_v3, %v1342_v63  ;;  %v1344_v9 = vpop.f32.mrf.mxu0 }
 0x20d   : > { %v1537_v12 = vpop.f32.mrf.mxu1 }
 0x20e   : > { %v4004_v16 = vadd.f32 %v1537_v12, %v1344_v9  ;;  %v1346_v18 = vpop.f32.mrf.mxu0 }
 0x20f   : > { %v1539_v22 = vpop.f32.mrf.mxu1 }
 0x210   : > { %v4006_v25 = vadd.f32 %v1539_v22, %v1346_v18  ;;  %v1350_v30 = vpop.f32.mrf.mxu0 }
 0x211   : > { %v1543_v31 = vpop.f32.mrf.mxu1 }
 0x212   : > { %4510 = vst [vmem:[#allocation24_spill] sm:$0xff] %v4006_v25  ;;  %v4008_v36 = vadd.f32 %v1543_v31, %v1350_v30  ;;  %v1352_v39 = vpop.f32.mrf.mxu0 }
 0x213   : > { %v1545_v43 = vpop.f32.mrf.mxu1 }
 0x214   : > { %4511 = vst [vmem:[#allocation25_spill] sm:$0xff] %v4008_v36  ;;  %v4010_v45 = vadd.f32 %v1545_v43, %v1352_v39  ;;  %v1354_v49 = vpop.f32.mrf.mxu0 }
 0x215   : > { %v1547_v52 = vpop.f32.mrf.mxu1 }
 0x216   : > { %4512 = vst [vmem:[#allocation26_spill] sm:$0xff] %v4010_v45  ;;  %v4012_v57 = vadd.f32 %v1547_v52, %v1354_v49  ;;  %v1356_v58 = vpop.f32.mrf.mxu0 }
 0x217   : > { %v1549_v63 = vpop.f32.mrf.mxu1 }
 0x218   : > { %4513 = vst [vmem:[#allocation27_spill] sm:$0xff] %v4012_v57  ;;  %v4014_v3 = vadd.f32 %v1549_v63, %v1356_v58  ;;  %v1360_v9 = vpop.f32.mrf.mxu0 }
 0x219   : > { %v1553_v12 = vpop.f32.mrf.mxu1 }
 0x21a   : > { %4514 = vst [vmem:[#allocation28_spill] sm:$0xff] %v4014_v3  ;;  %v4016_v18 = vadd.f32 %v1553_v12, %v1360_v9  ;;  %v1362_v22 = vpop.f32.mrf.mxu0 }
 0x21b   : > { %v1555_v25 = vpop.f32.mrf.mxu1 }
 0x21c   : > { %4515 = vst [vmem:[#allocation29_spill] sm:$0xff] %v4016_v18  ;;  %v4018_v30 = vadd.f32 %v1555_v25, %v1362_v22  ;;  %v1364_v31 = vpop.f32.mrf.mxu0 }
 0x21d   : > { %v1557_v36 = vpop.f32.mrf.mxu1 }
 0x21e   : > { %v4020_v39 = vadd.f32 %v1557_v36, %v1364_v31  ;;  %v1366_v43 = vpop.f32.mrf.mxu0 }
 0x21f   : > { %v1559_v45 = vpop.f32.mrf.mxu1 }
 0x220   : > { %4516 = vst [vmem:[#allocation30_spill] sm:$0xff] %v4020_v39  ;;  %v4022_v49 = vadd.f32 %v1559_v45, %v1366_v43  ;;  %v1370_v52 = vpop.f32.mrf.mxu0 }
 0x221   : > { %v1563_v57 = vpop.f32.mrf.mxu1 }
 0x222   : > { %4517 = vst [vmem:[#allocation31_spill] sm:$0xff] %v4022_v49  ;;  %v4024_v58 = vadd.f32 %v1563_v57, %v1370_v52  ;;  %v1372_v63 = vpop.f32.mrf.mxu0 }
 0x223   : > { %v1565_v3 = vpop.f32.mrf.mxu1 }
 0x224   : > { %4518 = vst [vmem:[#allocation32_spill] sm:$0xff] %v4024_v58  ;;  %v4026_v9 = vadd.f32 %v1565_v3, %v1372_v63  ;;  %v1374_v12 = vpop.f32.mrf.mxu0 }
 0x225   : > { %v1567_v18 = vpop.f32.mrf.mxu1 }
 0x226   : > { %4519 = vst [vmem:[#allocation33_spill] sm:$0xff] %v4026_v9  ;;  %v4028_v25 = vadd.f32 %v1567_v18, %v1374_v12  ;;  %v1376_v22 = vpop.f32.mrf.mxu0 }
 0x227   : > { %v1569_v36 = vpop.f32.mrf.mxu1 }
 0x228   : > { %v4030_v31 = vadd.f32 %v1569_v36, %v1376_v22  ;;  %v1380_v39 = vpop.f32.mrf.mxu0 }
 0x229   : > { %v1573_v45 = vpop.f32.mrf.mxu1 }
 0x22a   : > { %4520 = vst [vmem:[#allocation34_spill] sm:$0xff] %v4030_v31  ;;  %v4032_v43 = vadd.f32 %v1573_v45, %v1380_v39  ;;  %v1382_v49 = vpop.f32.mrf.mxu0 }
 0x22b   : > { %v1575_v57 = vpop.f32.mrf.mxu1 }
 0x22c   : > { %4521 = vst [vmem:[#allocation35_spill] sm:$0xff] %v4032_v43  ;;  %v4034_v52 = vadd.f32 %v1575_v57, %v1382_v49  ;;  %v1384_v58 = vpop.f32.mrf.mxu0 }
 0x22d   : > { %v1577_v3 = vpop.f32.mrf.mxu1 }
 0x22e   : > { %4522 = vst [vmem:[#allocation36_spill] sm:$0xff] %v4034_v52  ;;  %v4036_v63 = vadd.f32 %v1577_v3, %v1384_v58  ;;  %v1386_v9 = vpop.f32.mrf.mxu0  ;;  %1585 = sbr.rel (%p2826_p0) target bundleno = 595 (0x253), region = 52 }
 0x22f   : > { %v1579_v18 = vpop.f32.mrf.mxu1 }
 0x230   : > { %4523 = vst [vmem:[#allocation37_spill] sm:$0xff] %v4036_v63  ;;  %v4038_v12 = vadd.f32 %v1579_v18, %v1386_v9 }
 0x232   : > { %4524 = vst [vmem:[#allocation38_spill] sm:$0xff] %v4038_v12 }
 0x233   : > { %1586 = vst [vmem:[#allocation2 + $0xb0] sm:$0xff] %v3912_v2  ;;  %1587 = vst [vmem:[#allocation2 + $0x1b0] sm:$0xff] %v3914_v5  ;;  %v4526_v39 = vld [vmem:[#allocation24_spill] sm:$0xff]  ;;  %v4527_v49 = vld [vmem:[#allocation25_spill] sm:$0xff] }
 0x234   : > { %1588 = vst [vmem:[#allocation2 + $0xd8] sm:$0xff] %v3916_v8  ;;  %1589 = vst [vmem:[#allocation2 + $0x18] sm:$0xff] %v3918_v11  ;;  %v4528_v58 = vld [vmem:[#allocation26_spill] sm:$0xff]  ;;  %v4529_v9 = vld [vmem:[#allocation27_spill] sm:$0xff] }
 0x235   : > { %1590 = vst [vmem:[#allocation2 + $0x50] sm:$0xff] %v3920_v14  ;;  %1591 = vst [vmem:[#allocation2 + $0x168] sm:$0xff] %v3922_v17  ;;  %v4530_v22 = vld [vmem:[#allocation28_spill] sm:$0xff]  ;;  %v4531_v36 = vld [vmem:[#allocation29_spill] sm:$0xff] }
 0x236   : > { %1592 = vst [vmem:[#allocation2 + $0x130] sm:$0xff] %v3924_v20  ;;  %1593 = vst [vmem:[#allocation2 + $0x48] sm:$0xff] %v3926_v23  ;;  %v4532_v45 = vld [vmem:[#allocation30_spill] sm:$0xff]  ;;  %v4533_v57 = vld [vmem:[#allocation31_spill] sm:$0xff] }
 0x237   : > { %1594 = vst [vmem:[#allocation2 + $0x180] sm:$0xff] %v3928_v26  ;;  %1595 = vst [vmem:[#allocation2 + $0x110] sm:$0xff] %v3930_v29  ;;  %v4534_v3 = vld [vmem:[#allocation32_spill] sm:$0xff]  ;;  %v4535_v18 = vld [vmem:[#allocation33_spill] sm:$0xff] }
 0x238   : > { %1596 = vst [vmem:[#allocation2 + $0x118] sm:$0xff] %v3932_v32  ;;  %1597 = vst [vmem:[#allocation2 + $0x98] sm:$0xff] %v3934_v35 }
 0x239   : > { %1598 = vst [vmem:[#allocation2 + $0x120] sm:$0xff] %v3936_v38  ;;  %1599 = vst [vmem:[#allocation2 + $0x150] sm:$0xff] %v3938_v41 }
 0x23a   : > { %1600 = vst [vmem:[#allocation2 + $0x108] sm:$0xff] %v3940_v44  ;;  %1601 = vst [vmem:[#allocation2 + $0x60] sm:$0xff] %v3942_v47 }
 0x23b   : > { %1602 = vst [vmem:[#allocation2 + $0xe0] sm:$0xff] %v3944_v50  ;;  %1603 = vst [vmem:[#allocation2 + $0x188] sm:$0xff] %v3946_v53 }
 0x23c   : > { %1604 = vst [vmem:[#allocation2 + $0x138] sm:$0xff] %v3948_v56  ;;  %1605 = vst [vmem:[#allocation2 + $0x140] sm:$0xff] %v3950_v59 }
 0x23d   : > { %1606 = vst [vmem:[#allocation2 + $0x80] sm:$0xff] %v3952_v62  ;;  %1607 = vst [vmem:[#allocation2 + $0x1a8] sm:$0xff] %v3954_v1 }
 0x23e   : > { %1608 = vst [vmem:[#allocation2 + $0x1b8] sm:$0xff] %v3956_v6  ;;  %1609 = vst [vmem:[#allocation2 + $0x28] sm:$0xff] %v3958_v10 }
 0x23f   : > { %1610 = vst [vmem:[#allocation2 + $0x1e8] sm:$0xff] %v3960_v15  ;;  %1611 = vst [vmem:[#allocation2 + $0xf8] sm:$0xff] %v3962_v19 }
 0x240   : > { %1612 = vst [vmem:[#allocation2 + $0x160] sm:$0xff] %v3964_v24  ;;  %1613 = vst [vmem:[#allocation2 + $0x30] sm:$0xff] %v3966_v28 }
 0x241   : > { %1614 = vst [vmem:[#allocation2 + $0x1e0] sm:$0xff] %v3968_v33  ;;  %1615 = vst [vmem:[#allocation2] sm:$0xff] %v3970_v37 }
 0x242   : > { %1616 = vst [vmem:[#allocation2 + $0xf0] sm:$0xff] %v3972_v42  ;;  %1617 = vst [vmem:[#allocation2 + $0x8] sm:$0xff] %v3974_v46 }
 0x243   : > { %1618 = vst [vmem:[#allocation2 + $0x148] sm:$0xff] %v3976_v51  ;;  %1619 = vst [vmem:[#allocation2 + $0x1d0] sm:$0xff] %v3978_v55 }
 0x244   : > { %1620 = vst [vmem:[#allocation2 + $0x100] sm:$0xff] %v3980_v60  ;;  %1621 = vst [vmem:[#allocation2 + $0xc8] sm:$0xff] %v3982_v0 }
 0x245   : > { %1622 = vst [vmem:[#allocation2 + $0x40] sm:$0xff] %v3984_v7  ;;  %1623 = vst [vmem:[#allocation2 + $0x1f8] sm:$0xff] %v3986_v13 }
 0x246   : > { %1624 = vst [vmem:[#allocation2 + $0x20] sm:$0xff] %v3988_v21  ;;  %1625 = vst [vmem:[#allocation2 + $0x128] sm:$0xff] %v3990_v27 }
 0x247   : > { %1626 = vst [vmem:[#allocation2 + $0x1a0] sm:$0xff] %v3992_v34  ;;  %1627 = vst [vmem:[#allocation2 + $0x1f0] sm:$0xff] %v3994_v40 }
 0x248   : > { %1628 = vst [vmem:[#allocation2 + $0xe8] sm:$0xff] %v3996_v48  ;;  %1629 = vst [vmem:[#allocation2 + $0x78] sm:$0xff] %v3998_v54 }
 0x249   : > { %1630 = vst [vmem:[#allocation2 + $0x70] sm:$0xff] %v4000_v61  ;;  %1631 = vst [vmem:[#allocation2 + $0x90] sm:$0xff] %v4002_v4 }
 0x24a   : > { %1632 = vst [vmem:[#allocation2 + $0x1d8] sm:$0xff] %v4004_v16  ;;  %1633 = vst [vmem:[#allocation2 + $0xd0] sm:$0xff] %v4526_v39 }
 0x24b   : > { %1634 = vst [vmem:[#allocation2 + $0xb8] sm:$0xff] %v4527_v49  ;;  %1635 = vst [vmem:[#allocation2 + $0x88] sm:$0xff] %v4528_v58 }
 0x24c   : > { %1636 = vst [vmem:[#allocation2 + $0xa8] sm:$0xff] %v4529_v9  ;;  %1637 = vst [vmem:[#allocation2 + $0x1c8] sm:$0xff] %v4530_v22 }
 0x24d   : > { %1638 = vst [vmem:[#allocation2 + $0x170] sm:$0xff] %v4531_v36  ;;  %1639 = vst [vmem:[#allocation2 + $0x178] sm:$0xff] %v4018_v30 }
 0x24e   : > { %1640 = vst [vmem:[#allocation2 + $0x68] sm:$0xff] %v4532_v45  ;;  %1641 = vst [vmem:[#allocation2 + $0x190] sm:$0xff] %v4533_v57 }
 0x24f   : > { %1642 = vst [vmem:[#allocation2 + $0x198] sm:$0xff] %v4534_v3  ;;  %1643 = vst [vmem:[#allocation2 + $0x38] sm:$0xff] %v4535_v18 }
 0x250   : > { %1644 = vst [vmem:[#allocation2 + $0xc0] sm:$0xff] %v4028_v25  ;;  %1645 = vst [vmem:[#allocation2 + $0x1c0] sm:$0xff] %v4030_v31 }
 0x251   : > { %1646 = vst [vmem:[#allocation2 + $0x158] sm:$0xff] %v4032_v43  ;;  %1647 = vst [vmem:[#allocation2 + $0x10] sm:$0xff] %v4034_v52 }
 0x252   : > { %1648 = vst [vmem:[#allocation2 + $0x58] sm:$0xff] %v4036_v63  ;;  %1649 = vst [vmem:[#allocation2 + $0xa0] sm:$0xff] %v4038_v12 }
 0x253 PF: > { %s4536_s4 = sld [smem:[#allocation15_spill]] }
 0x259   : > { %p2827_p2 = scmp.le.s32.totalorder %s4536_s4, 0 }
 0x25b   : > { %1653 = sbr.rel (%p2827_p2) target bundleno = 647 (0x287), region = 56 }
 0x260   : > { %v1654_v39 = vld [vmem:[#allocation2 + $0xb0] sm:$0xff]  ;;  %v1656_v58 = vld [vmem:[#allocation2 + $0xd8] sm:$0xff]  ;;  %v1659_v3 = vld [vmem:[#allocation2 + $0x168] sm:$0xff] }
 0x261   : > { %v1655_v49 = vld [vmem:[#allocation2 + $0x1b0] sm:$0xff]  ;;  %v1718_v9 = vadd.f32 %v1654_v39, %v3912_v2  ;;  %v1720_v36 = vadd.f32 %v1656_v58, %v3916_v8  ;;  %v1657_v45 = vld [vmem:[#allocation2 + $0x18] sm:$0xff]  ;;  %v1723_v63 = vadd.f32 %v1659_v3, %v3922_v17  ;;  %v1661_v43 = vld [vmem:[#allocation2 + $0x48] sm:$0xff] }
 0x262   : > { %v1719_v22 = vadd.f32 %v1655_v49, %v3914_v5  ;;  %v1658_v57 = vld [vmem:[#allocation2 + $0x50] sm:$0xff]  ;;  %v1721_v18 = vadd.f32 %v1657_v45, %v3918_v11  ;;  %v1662_v31 = vld [vmem:[#allocation2 + $0x180] sm:$0xff]  ;;  %v1725_v5 = vadd.f32 %v1661_v43, %v3926_v23  ;;  %v1664_v49 = vld [vmem:[#allocation2 + $0x118] sm:$0xff] }
 0x263   : > { %v1722_v12 = vadd.f32 %v1658_v57, %v3920_v14  ;;  %v1660_v52 = vld [vmem:[#allocation2 + $0x130] sm:$0xff]  ;;  %1782 = vst [vmem:[#allocation2 + $0xb0] sm:$0xff] %v1718_v9  ;;  %1784 = vst [vmem:[#allocation2 + $0xd8] sm:$0xff] %v1720_v36  ;;  %v1726_v8 = vadd.f32 %v1662_v31, %v3928_v26  ;;  %v1665_v58 = vld [vmem:[#allocation2 + $0x98] sm:$0xff]  ;;  %v1728_v14 = vadd.f32 %v1664_v49, %v3932_v32 }
 0x264   : > { %1783 = vst [vmem:[#allocation2 + $0x1b0] sm:$0xff] %v1719_v22  ;;  %v1724_v2 = vadd.f32 %v1660_v52, %v3924_v20  ;;  %v1663_v39 = vld [vmem:[#allocation2 + $0x110] sm:$0xff]  ;;  %1785 = vst [vmem:[#allocation2 + $0x18] sm:$0xff] %v1721_v18  ;;  %v1729_v17 = vadd.f32 %v1665_v58, %v3934_v35  ;;  %v1666_v9 = vld [vmem:[#allocation2 + $0x120] sm:$0xff] }
 0x265   : > { %1786 = vst [vmem:[#allocation2 + $0x50] sm:$0xff] %v1722_v12  ;;  %1787 = vst [vmem:[#allocation2 + $0x168] sm:$0xff] %v1723_v63  ;;  %v1727_v11 = vadd.f32 %v1663_v39, %v3930_v29  ;;  %v1667_v22 = vld [vmem:[#allocation2 + $0x150] sm:$0xff]  ;;  %v1668_v36 = vld [vmem:[#allocation2 + $0x108] sm:$0xff]  ;;  %v1730_v20 = vadd.f32 %v1666_v9, %v3936_v38 }
 0x266   : > { %1788 = vst [vmem:[#allocation2 + $0x130] sm:$0xff] %v1724_v2  ;;  %1789 = vst [vmem:[#allocation2 + $0x48] sm:$0xff] %v1725_v5  ;;  %v1731_v23 = vadd.f32 %v1667_v22, %v3938_v41  ;;  %v1732_v26 = vadd.f32 %v1668_v36, %v3940_v44  ;;  %v1669_v31 = vld [vmem:[#allocation2 + $0x60] sm:$0xff]  ;;  %v1671_v52 = vld [vmem:[#allocation2 + $0x188] sm:$0xff] }
 0x267   : > { %1790 = vst [vmem:[#allocation2 + $0x180] sm:$0xff] %v1726_v8  ;;  %v1670_v43 = vld [vmem:[#allocation2 + $0xe0] sm:$0xff]  ;;  %1791 = vst [vmem:[#allocation2 + $0x110] sm:$0xff] %v1727_v11  ;;  %v1733_v29 = vadd.f32 %v1669_v31, %v3942_v47  ;;  %v1735_v35 = vadd.f32 %v1671_v52, %v3946_v53  ;;  %v1672_v63 = vld [vmem:[#allocation2 + $0x138] sm:$0xff] }
 0x268   : > { %1792 = vst [vmem:[#allocation2 + $0x118] sm:$0xff] %v1728_v14  ;;  %1793 = vst [vmem:[#allocation2 + $0x98] sm:$0xff] %v1729_v17  ;;  %v1734_v32 = vadd.f32 %v1670_v43, %v3944_v50  ;;  %v1673_v12 = vld [vmem:[#allocation2 + $0x140] sm:$0xff]  ;;  %v1736_v38 = vadd.f32 %v1672_v63, %v3948_v56  ;;  %v1675_v57 = vld [vmem:[#allocation2 + $0x1a8] sm:$0xff] }
 0x269   : > { %v1674_v45 = vld [vmem:[#allocation2 + $0x80] sm:$0xff]  ;;  %1794 = vst [vmem:[#allocation2 + $0x120] sm:$0xff] %v1730_v20  ;;  %1795 = vst [vmem:[#allocation2 + $0x150] sm:$0xff] %v1731_v23  ;;  %v1737_v41 = vadd.f32 %v1673_v12, %v3950_v59  ;;  %v1676_v3 = vld [vmem:[#allocation2 + $0x1b8] sm:$0xff]  ;;  %v1739_v47 = vadd.f32 %v1675_v57, %v3954_v1 }
 0x26a   : > { %1796 = vst [vmem:[#allocation2 + $0x108] sm:$0xff] %v1732_v26  ;;  %v1738_v44 = vadd.f32 %v1674_v45, %v3952_v62  ;;  %v1677_v18 = vld [vmem:[#allocation2 + $0x28] sm:$0xff]  ;;  %1797 = vst [vmem:[#allocation2 + $0x60] sm:$0xff] %v1733_v29  ;;  %v1740_v50 = vadd.f32 %v1676_v3, %v3956_v6  ;;  %v1679_v5 = vld [vmem:[#allocation2 + $0xf8] sm:$0xff] }
 0x26b   : > { %1798 = vst [vmem:[#allocation2 + $0xe0] sm:$0xff] %v1734_v32  ;;  %1799 = vst [vmem:[#allocation2 + $0x188] sm:$0xff] %v1735_v35  ;;  %v1741_v53 = vadd.f32 %v1677_v18, %v3958_v10  ;;  %v1678_v2 = vld [vmem:[#allocation2 + $0x1e8] sm:$0xff]  ;;  %v1680_v8 = vld [vmem:[#allocation2 + $0x160] sm:$0xff]  ;;  %v1743_v59 = vadd.f32 %v1679_v5, %v3962_v19 }
 0x26c   : > { %1800 = vst [vmem:[#allocation2 + $0x138] sm:$0xff] %v1736_v38  ;;  %1801 = vst [vmem:[#allocation2 + $0x140] sm:$0xff] %v1737_v41  ;;  %v1742_v56 = vadd.f32 %v1678_v2, %v3960_v15  ;;  %v1744_v62 = vadd.f32 %v1680_v8, %v3964_v24  ;;  %v1681_v39 = vld [vmem:[#allocation2 + $0x30] sm:$0xff]  ;;  %v1682_v49 = vld [vmem:[#allocation2 + $0x1e0] sm:$0xff] }
 0x26d   : > { %1802 = vst [vmem:[#allocation2 + $0x80] sm:$0xff] %v1738_v44  ;;  %v1683_v58 = vld [vmem:[#allocation2] sm:$0xff]  ;;  %1803 = vst [vmem:[#allocation2 + $0x1a8] sm:$0xff] %v1739_v47  ;;  %v1745_v1 = vadd.f32 %v1681_v39, %v3966_v28  ;;  %v1746_v6 = vadd.f32 %v1682_v49, %v3968_v33  ;;  %v1684_v11 = vld [vmem:[#allocation2 + $0xf0] sm:$0xff] }
 0x26e   : > { %1804 = vst [vmem:[#allocation2 + $0x1b8] sm:$0xff] %v1740_v50  ;;  %1805 = vst [vmem:[#allocation2 + $0x28] sm:$0xff] %v1741_v53  ;;  %v1747_v10 = vadd.f32 %v1683_v58, %v3970_v37  ;;  %v1685_v14 = vld [vmem:[#allocation2 + $0x8] sm:$0xff]  ;;  %v1748_v15 = vadd.f32 %v1684_v11, %v3972_v42  ;;  %v1687_v9 = vld [vmem:[#allocation2 + $0x1d0] sm:$0xff] }
 0x26f   : > { %v1686_v17 = vld [vmem:[#allocation2 + $0x148] sm:$0xff]  ;;  %1806 = vst [vmem:[#allocation2 + $0x1e8] sm:$0xff] %v1742_v56  ;;  %1807 = vst [vmem:[#allocation2 + $0xf8] sm:$0xff] %v1743_v59  ;;  %v1749_v19 = vadd.f32 %v1685_v14, %v3974_v46  ;;  %v1688_v22 = vld [vmem:[#allocation2 + $0x100] sm:$0xff]  ;;  %v1751_v28 = vadd.f32 %v1687_v9, %v3978_v55 }
 0x270   : > { %1808 = vst [vmem:[#allocation2 + $0x160] sm:$0xff] %v1744_v62  ;;  %v1750_v24 = vadd.f32 %v1686_v17, %v3976_v51  ;;  %v1689_v36 = vld [vmem:[#allocation2 + $0xc8] sm:$0xff]  ;;  %1809 = vst [vmem:[#allocation2 + $0x30] sm:$0xff] %v1745_v1  ;;  %v1752_v33 = vadd.f32 %v1688_v22, %v3980_v60  ;;  %v1690_v20 = vld [vmem:[#allocation2 + $0x40] sm:$0xff] }
 0x271   : > { %1810 = vst [vmem:[#allocation2 + $0x1e0] sm:$0xff] %v1746_v6  ;;  %1811 = vst [vmem:[#allocation2] sm:$0xff] %v1747_v10  ;;  %v1753_v37 = vadd.f32 %v1689_v36, %v3982_v0  ;;  %v1691_v23 = vld [vmem:[#allocation2 + $0x1f8] sm:$0xff]  ;;  %v1692_v26 = vld [vmem:[#allocation2 + $0x20] sm:$0xff]  ;;  %v1754_v42 = vadd.f32 %v1690_v20, %v3984_v7 }
 0x272   : > { %1812 = vst [vmem:[#allocation2 + $0xf0] sm:$0xff] %v1748_v15  ;;  %1813 = vst [vmem:[#allocation2 + $0x8] sm:$0xff] %v1749_v19  ;;  %v1755_v46 = vadd.f32 %v1691_v23, %v3986_v13  ;;  %v1756_v51 = vadd.f32 %v1692_v26, %v3988_v21  ;;  %v1693_v31 = vld [vmem:[#allocation2 + $0x128] sm:$0xff]  ;;  %v1694_v43 = vld [vmem:[#allocation2 + $0x1a0] sm:$0xff] }
 0x273   : > { %1814 = vst [vmem:[#allocation2 + $0x148] sm:$0xff] %v1750_v24  ;;  %v1695_v52 = vld [vmem:[#allocation2 + $0x1f0] sm:$0xff]  ;;  %1815 = vst [vmem:[#allocation2 + $0x1d0] sm:$0xff] %v1751_v28  ;;  %v1757_v55 = vadd.f32 %v1693_v31, %v3990_v27  ;;  %v1758_v60 = vadd.f32 %v1694_v43, %v3992_v34  ;;  %v1696_v29 = vld [vmem:[#allocation2 + $0xe8] sm:$0xff] }
 0x274   : > { %1816 = vst [vmem:[#allocation2 + $0x100] sm:$0xff] %v1752_v33  ;;  %1817 = vst [vmem:[#allocation2 + $0xc8] sm:$0xff] %v1753_v37  ;;  %v1759_v0 = vadd.f32 %v1695_v52, %v3994_v40  ;;  %v1697_v32 = vld [vmem:[#allocation2 + $0x78] sm:$0xff]  ;;  %v1698_v35 = vld [vmem:[#allocation2 + $0x70] sm:$0xff]  ;;  %v1760_v7 = vadd.f32 %v1696_v29, %v3996_v48 }
 0x275   : > { %1818 = vst [vmem:[#allocation2 + $0x40] sm:$0xff] %v1754_v42  ;;  %1819 = vst [vmem:[#allocation2 + $0x1f8] sm:$0xff] %v1755_v46  ;;  %v1761_v13 = vadd.f32 %v1697_v32, %v3998_v54  ;;  %v1762_v21 = vadd.f32 %v1698_v35, %v4000_v61  ;;  %v1699_v63 = vld [vmem:[#allocation2 + $0x90] sm:$0xff]  ;;  %v1700_v12 = vld [vmem:[#allocation2 + $0x1d8] sm:$0xff] }
 0x276   : > { %1820 = vst [vmem:[#allocation2 + $0x20] sm:$0xff] %v1756_v51  ;;  %v1701_v45 = vld [vmem:[#allocation2 + $0xd0] sm:$0xff]  ;;  %1821 = vst [vmem:[#allocation2 + $0x128] sm:$0xff] %v1757_v55  ;;  %v1763_v27 = vadd.f32 %v1699_v63, %v4002_v4  ;;  %v1764_v34 = vadd.f32 %v1700_v12, %v4004_v16  ;;  %v4537_v40 = vld [vmem:[#allocation24_spill] sm:$0xff] }
 0x277   : > { %1822 = vst [vmem:[#allocation2 + $0x1a0] sm:$0xff] %v1758_v60  ;;  %1823 = vst [vmem:[#allocation2 + $0x1f0] sm:$0xff] %v1759_v0  ;;  %v1765_v38 = vadd.f32 %v1701_v45, %v4537_v40  ;;  %v1702_v41 = vld [vmem:[#allocation2 + $0xb8] sm:$0xff]  ;;  %v1703_v44 = vld [vmem:[#allocation2 + $0x88] sm:$0xff] }
 0x278   : > { %v1704_v57 = vld [vmem:[#allocation2 + $0xa8] sm:$0xff]  ;;  %1824 = vst [vmem:[#allocation2 + $0xe8] sm:$0xff] %v1760_v7  ;;  %1825 = vst [vmem:[#allocation2 + $0x78] sm:$0xff] %v1761_v13  ;;  %v4539_v61 = vld [vmem:[#allocation26_spill] sm:$0xff] }
 0x279   : > { %1826 = vst [vmem:[#allocation2 + $0x70] sm:$0xff] %v1762_v21  ;;  %v4538_v48 = vld [vmem:[#allocation25_spill] sm:$0xff]  ;;  %v1767_v3 = vadd.f32 %v1703_v44, %v4539_v61  ;;  %v4540_v18 = vld [vmem:[#allocation27_spill] sm:$0xff]  ;;  %v1706_v53 = vld [vmem:[#allocation2 + $0x170] sm:$0xff] }
 0x27a   : > { %v1766_v54 = vadd.f32 %v1702_v41, %v4538_v48  ;;  %v1768_v47 = vadd.f32 %v1704_v57, %v4540_v18  ;;  %v1705_v50 = vld [vmem:[#allocation2 + $0x1c8] sm:$0xff]  ;;  %v1707_v2 = vld [vmem:[#allocation2 + $0x178] sm:$0xff]  ;;  %1827 = vst [vmem:[#allocation2 + $0x90] sm:$0xff] %v1763_v27  ;;  %1828 = vst [vmem:[#allocation2 + $0x1d8] sm:$0xff] %v1764_v34 }
 0x27b   : > { %1829 = vst [vmem:[#allocation2 + $0xd0] sm:$0xff] %v1765_v38  ;;  %v4541_v4 = vld [vmem:[#allocation28_spill] sm:$0xff]  ;;  %v4542_v5 = vld [vmem:[#allocation29_spill] sm:$0xff]  ;;  %v1771_v56 = vadd.f32 %v1707_v2, %v4018_v30  ;;  %v1709_v62 = vld [vmem:[#allocation2 + $0x190] sm:$0xff] }
 0x27c   : > { %v1769_v16 = vadd.f32 %v1705_v50, %v4541_v4  ;;  %v1770_v8 = vadd.f32 %v1706_v53, %v4542_v5  ;;  %v1708_v59 = vld [vmem:[#allocation2 + $0x68] sm:$0xff]  ;;  %v1710_v39 = vld [vmem:[#allocation2 + $0x198] sm:$0xff]  ;;  %1830 = vst [vmem:[#allocation2 + $0xb8] sm:$0xff] %v1766_v54  ;;  %1831 = vst [vmem:[#allocation2 + $0x88] sm:$0xff] %v1767_v3 }
 0x27d   : > { %1832 = vst [vmem:[#allocation2 + $0xa8] sm:$0xff] %v1768_v47  ;;  %v4543_v49 = vld [vmem:[#allocation30_spill] sm:$0xff]  ;;  %v4544_v1 = vld [vmem:[#allocation31_spill] sm:$0xff]  ;;  %v4545_v10 = vld [vmem:[#allocation32_spill] sm:$0xff] }
 0x27e   : > { %v1772_v58 = vadd.f32 %v1708_v59, %v4543_v49  ;;  %v1773_v6 = vadd.f32 %v1709_v62, %v4544_v1  ;;  %v1774_v11 = vadd.f32 %v1710_v39, %v4545_v10  ;;  %v1711_v14 = vld [vmem:[#allocation2 + $0x38] sm:$0xff]  ;;  %v1712_v17 = vld [vmem:[#allocation2 + $0xc0] sm:$0xff]  ;;  %1833 = vst [vmem:[#allocation2 + $0x1c8] sm:$0xff] %v1769_v16  ;;  %1834 = vst [vmem:[#allocation2 + $0x170] sm:$0xff] %v1770_v8 }
 0x27f   : > { %v1713_v15 = vld [vmem:[#allocation2 + $0x1c0] sm:$0xff]  ;;  %1835 = vst [vmem:[#allocation2 + $0x178] sm:$0xff] %v1771_v56  ;;  %v4546_v19 = vld [vmem:[#allocation33_spill] sm:$0xff]  ;;  %v1776_v24 = vadd.f32 %v1712_v17, %v4028_v25  ;;  %v4547_v9 = vld [vmem:[#allocation34_spill] sm:$0xff] }
 0x280   : > { %v1775_v30 = vadd.f32 %v1711_v14, %v4546_v19  ;;  %v1777_v22 = vadd.f32 %v1713_v15, %v4547_v9  ;;  %v1714_v36 = vld [vmem:[#allocation2 + $0x158] sm:$0xff]  ;;  %v1715_v28 = vld [vmem:[#allocation2 + $0x10] sm:$0xff]  ;;  %1836 = vst [vmem:[#allocation2 + $0x68] sm:$0xff] %v1772_v58  ;;  %1837 = vst [vmem:[#allocation2 + $0x190] sm:$0xff] %v1773_v6 }
 0x281   : > { %v1716_v33 = vld [vmem:[#allocation2 + $0x58] sm:$0xff]  ;;  %1838 = vst [vmem:[#allocation2 + $0x198] sm:$0xff] %v1774_v11  ;;  %v4549_v23 = vld [vmem:[#allocation36_spill] sm:$0xff]  ;;  %v4550_v42 = vld [vmem:[#allocation37_spill] sm:$0xff] }
 0x282   : > { %v4548_v37 = vld [vmem:[#allocation35_spill] sm:$0xff]  ;;  %v1779_v26 = vadd.f32 %v1715_v28, %v4549_v23  ;;  %v1780_v46 = vadd.f32 %v1716_v33, %v4550_v42  ;;  %v1717_v51 = vld [vmem:[#allocation2 + $0xa0] sm:$0xff]  ;;  %1839 = vst [vmem:[#allocation2 + $0x38] sm:$0xff] %v1775_v30  ;;  %1840 = vst [vmem:[#allocation2 + $0xc0] sm:$0xff] %v1776_v24 }
 0x283   : > { %v1778_v20 = vadd.f32 %v1714_v36, %v4548_v37  ;;  %1841 = vst [vmem:[#allocation2 + $0x1c0] sm:$0xff] %v1777_v22  ;;  %v4551_v31 = vld [vmem:[#allocation38_spill] sm:$0xff] }
 0x284   : > { %v1781_v25 = vadd.f32 %v1717_v51, %v4551_v31  ;;  %1843 = vst [vmem:[#allocation2 + $0x10] sm:$0xff] %v1779_v26  ;;  %1844 = vst [vmem:[#allocation2 + $0x58] sm:$0xff] %v1780_v46 }
 0x285   : > { %1842 = vst [vmem:[#allocation2 + $0x158] sm:$0xff] %v1778_v20 }
 0x286   : > { %1845 = vst [vmem:[#allocation2 + $0xa0] sm:$0xff] %v1781_v25 }
 0x287 PF: > { %s4552_s22 = sld [smem:[#allocation15_spill]] }
 0x28d   : > { %p2828_p13 = scmp.ne.s32.totalorder %s4552_s22, 1 }
 0x28f   : > { %1849 = sbr.rel (%p2828_p13) target bundleno = 927 (0x39f), region = 60 }
 0x294   : > { %v2845_v43 = vld.sshfl [vmem:[%s3788_s21] sm:$0x33 pattern:$0x76325410]  ;;  %vm2021_vm0 = vcmask 1041408   ;;  %v3464_v60 = vmov 0   ;;  %v2351_v57 = vlaneseq }
 0x295   : > { %v1971_v52 = vcombine.high %v2845_v43, %v2845_v43  ;;  %v2023_v55 = vsel %vm2021_vm0, %v2845_v43, 0  ;;  %2060 = vmatprep.mubr.bf16.mxu0 %v3464_v60  ;;  %2140 = vmatprep.mubr.bf16.mxu1 %v3464_v60  ;;  %v3221_v0 = vld [vmem:[%s3774_s1] sm:$0xff]   ;;  %vm1972_vm1 = vcmask 31744   ;;  %v3223_v32 = vld [vmem:[%s3774_s1 + $0x8] sm:$0xff]   ;;  %v3225_v7 = vld [vmem:[%s3774_s1 + $0x10] sm:$0xff]  }
 0x296   : > { %v3222_v29 = vld [vmem:[%s3774_s1 + $0x40] sm:$0xff]   ;;  %v3224_v35 = vld [vmem:[%s3774_s1 + $0x48] sm:$0xff]   ;;  %v3226_v13 = vld [vmem:[%s3774_s1 + $0x50] sm:$0xff]   ;;  %v2352_v48 = vshrl.u32 %v2351_v57, 7 }
 0x297   : > { %2846 = vmatprep.subr.msk.bf16.mxu0 %vm2021_vm0, %v1971_v52  ;;  %2873 = vmatprep.subr.msk.bf16.mxu1 %vm2021_vm0, %v1971_v52  ;;  %v3227_v21 = vld [vmem:[%s3774_s1 + $0x18] sm:$0xff]   ;;  %v3229_v12 = vld [vmem:[%s3774_s1 + $0x20] sm:$0xff]   ;;  %v3231_v27 = vld [vmem:[%s3774_s1 + $0x28] sm:$0xff]  }
 0x298   : > { %2043 = vmatpush1.bf16.msra.mxu0 %v2023_v55  ;;  %2874 = vmatpush1.bf16.msra.mxu1 %v2023_v55  ;;  %v3228_v63 = vld [vmem:[%s3774_s1 + $0x58] sm:$0xff]   ;;  %v3230_v45 = vld [vmem:[%s3774_s1 + $0x60] sm:$0xff]   ;;  %v3232_v34 = vld [vmem:[%s3774_s1 + $0x68] sm:$0xff]   ;;  %v2353_v54 = vsub.s32 0, %v2352_v48  ;;  %v2357_v3 = vsub.s32 1, %v2352_v48 }
 0x299   : > { %v3233_v40 = vld [vmem:[%s3774_s1 + $0x30] sm:$0xff]   ;;  %v3235_v41 = vld [vmem:[%s3774_s1 + $0x38] sm:$0xff]   ;;  %v2349_v61 = vld [vmem:[%s422_s16] sm:$0x3] }
 0x29a   : > { %v3234_v38 = vld [vmem:[%s3774_s1 + $0x70] sm:$0xff]   ;;  %v3236_v44 = vld [vmem:[%s3774_s1 + $0x78] sm:$0xff]   ;;  %v2253_v47 = vld [vmem:[#allocation2 + $0x148] sm:$0xff]  ;;  %v4212_v50 = vrot.slane %v2349_v61, %v2353_v54  ;;  %v4214_v56 = vrot.slane %v2349_v61, %v2357_v3 }
 0x29b   : > { %2847 = vmatmul.mubr.msk.bf16.vlgmr.msra.gmra.mxu0 %vm1972_vm1, %v3221_v0  ;;  %2855 = vmatmul.mubr.msk.bf16.vlgmr.msra.gmra.mxu1 %vm1972_vm1, %v3222_v29  ;;  %v2221_v18 = vld [vmem:[#allocation2 + $0xb0] sm:$0xff]  ;;  %v2223_v39 = vld [vmem:[#allocation2 + $0xd8] sm:$0xff]  ;;  %v2255_v49 = vld [vmem:[#allocation2 + $0x100] sm:$0xff] }
 0x29c   : > { %2070 = vmatprep.mubr.bf16.mxu0 %v3464_v60  ;;  %2150 = vmatprep.mubr.bf16.mxu1 %v3464_v60  ;;  %v2222_v4 = vld [vmem:[#allocation2 + $0x1b0] sm:$0xff]  ;;  %v2224_v17 = vld [vmem:[#allocation2 + $0x18] sm:$0xff]  ;;  %v2256_v15 = vld [vmem:[#allocation2 + $0xc8] sm:$0xff] }
 0x29d   : > { %v2254_v16 = vld [vmem:[#allocation2 + $0x1d0] sm:$0xff]  ;;  %v2257_v33 = vld [vmem:[#allocation2 + $0x40] sm:$0xff]  ;;  %v2226_v51 = vld [vmem:[#allocation2 + $0x168] sm:$0xff] }
 0x29e   : > { %v2225_v28 = vld [vmem:[#allocation2 + $0x50] sm:$0xff]  ;;  %v2258_v31 = vld [vmem:[#allocation2 + $0x1f8] sm:$0xff]  ;;  %v2229_v48 = vld [vmem:[#allocation2 + $0x180] sm:$0xff] }
 0x29f   : > { %v2227_v29 = vld [vmem:[#allocation2 + $0x130] sm:$0xff]  ;;  %v2261_v54 = vld [vmem:[#allocation2 + $0x1a0] sm:$0xff] }
 0x2a3   : > { %2848 = vmatmul.mubr.msk.bf16.gmra.mxu0 %vm1972_vm1, %v3223_v32  ;;  %2856 = vmatmul.mubr.msk.bf16.gmra.mxu1 %vm1972_vm1, %v3224_v35  ;;  %v2259_v32 = vld [vmem:[#allocation2 + $0x20] sm:$0xff] }
 0x2a4   : > { %2080 = vmatprep.mubr.bf16.mxu0 %v3464_v60  ;;  %2160 = vmatprep.mubr.bf16.mxu1 %v3464_v60 }
 0x2ab   : > { %2849 = vmatmul.mubr.msk.bf16.gmra.mxu0 %vm1972_vm1, %v3225_v7  ;;  %2857 = vmatmul.mubr.msk.bf16.gmra.mxu1 %vm1972_vm1, %v3226_v13 }
 0x2ac   : > { %2090 = vmatprep.mubr.bf16.mxu0 %v3464_v60  ;;  %2170 = vmatprep.mubr.bf16.mxu1 %v3464_v60 }
 0x2b3   : > { %2850 = vmatmul.mubr.msk.bf16.gmra.mxu0 %vm1972_vm1, %v3227_v21  ;;  %2858 = vmatmul.mubr.msk.bf16.gmra.mxu1 %vm1972_vm1, %v3228_v63 }
 0x2b4   : > { %2100 = vmatprep.mubr.bf16.mxu0 %v3464_v60  ;;  %2180 = vmatprep.mubr.bf16.mxu1 %v3464_v60 }
 0x2bb   : > { %2851 = vmatmul.mubr.msk.bf16.gmra.mxu0 %vm1972_vm1, %v3229_v12  ;;  %2859 = vmatmul.mubr.msk.bf16.gmra.mxu1 %vm1972_vm1, %v3230_v45  ;;  %v2228_v45 = vld [vmem:[#allocation2 + $0x48] sm:$0xff] }
 0x2bc   : > { %2110 = vmatprep.mubr.bf16.mxu0 %v3464_v60  ;;  %2190 = vmatprep.mubr.bf16.mxu1 %v3464_v60 }
 0x2c3   : > { %2852 = vmatmul.mubr.msk.bf16.gmra.mxu0 %vm1972_vm1, %v3231_v27  ;;  %2860 = vmatmul.mubr.msk.bf16.gmra.mxu1 %vm1972_vm1, %v3232_v34  ;;  %v2260_v27 = vld [vmem:[#allocation2 + $0x128] sm:$0xff] }
 0x2c4   : > { %2120 = vmatprep.mubr.bf16.mxu0 %v3464_v60  ;;  %2200 = vmatprep.mubr.bf16.mxu1 %v3464_v60 }
 0x2cb   : > { %2853 = vmatmul.mubr.msk.bf16.gmra.mxu0 %vm1972_vm1, %v3233_v40  ;;  %2861 = vmatmul.mubr.msk.bf16.gmra.mxu1 %vm1972_vm1, %v3234_v38 }
 0x2cc   : > { %2130 = vmatprep.mubr.bf16.mxu0 %v3464_v60  ;;  %2210 = vmatprep.mubr.bf16.mxu1 %v3464_v60 }
 0x2d3   : > { %2854 = vmatmul.mubr.msk.bf16.gmra.mxu0 %vm1972_vm1, %v3235_v41  ;;  %2862 = vmatmul.mubr.msk.bf16.gmra.mxu1 %vm1972_vm1, %v3236_v44 }
 0x35b   : > { %v2062_v53 = vpop.f32.mrf.mxu0  ;;  %v2142_v2 = vpop.f32.mrf.mxu1 }
 0x35c   : > { %v2285_v5 = vadd.f32 %v2221_v18, %v2062_v53  ;;  %v2317_v8 = vadd.f32 %v2253_v47, %v2142_v2 }
 0x35d   : > { %v2064_v59 = vpop.f32.mrf.mxu0  ;;  %v2144_v62 = vpop.f32.mrf.mxu1 }
 0x35e   : > { %v2361_v58 = vadd.f32 %v4212_v50, %v2285_v5  ;;  %v2393_v1 = vadd.f32 %v4212_v50, %v2317_v8  ;;  %v2286_v6 = vadd.f32 %v2222_v4, %v2064_v59  ;;  %v2318_v10 = vadd.f32 %v2254_v16, %v2144_v62  ;;  %v2230_v4 = vld [vmem:[#allocation2 + $0x110] sm:$0xff] }
 0x35f   : > { %v2066_v11 = vpop.f32.mrf.mxu0  ;;  %v2146_v14 = vpop.f32.mrf.mxu1  ;;  %v2262_v16 = vld [vmem:[#allocation2 + $0x1f0] sm:$0xff] }
 0x360   : > { %2425 = vst [vmem:[%s4041_s2] sm:$0xff] %v2361_v58  ;;  %2457 = vst [vmem:[%s4041_s2 + $0x100] sm:$0xff] %v2393_v1  ;;  %v2362_v19 = vadd.f32 %v4214_v56, %v2286_v6  ;;  %v2394_v30 = vadd.f32 %v4214_v56, %v2318_v10  ;;  %v2287_v24 = vadd.f32 %v2223_v39, %v2066_v11  ;;  %v2231_v58 = vld [vmem:[#allocation2 + $0x118] sm:$0xff]  ;;  %v2263_v1 = vld [vmem:[#allocation2 + $0xe8] sm:$0xff] }
 0x361   : > { %v2319_v9 = vadd.f32 %v2255_v49, %v2146_v14  ;;  %v2068_v22 = vpop.f32.mrf.mxu0  ;;  %v2148_v36 = vpop.f32.mrf.mxu1 }
 0x362   : > { %2426 = vst [vmem:[%s4041_s2 + $0x8] sm:$0xff] %v2362_v19  ;;  %2458 = vst [vmem:[%s4041_s2 + $0x108] sm:$0xff] %v2394_v30  ;;  %v2363_v37 = vadd.f32 %v4212_v50, %v2287_v24  ;;  %v2288_v23 = vadd.f32 %v2224_v17, %v2068_v22  ;;  %v2320_v26 = vadd.f32 %v2256_v15, %v2148_v36  ;;  %v2232_v19 = vld [vmem:[#allocation2 + $0x98] sm:$0xff] }
 0x363   : > { %v2395_v20 = vadd.f32 %v4212_v50, %v2319_v9  ;;  %v2072_v42 = vpop.f32.mrf.mxu0  ;;  %v2152_v46 = vpop.f32.mrf.mxu1  ;;  %v2264_v30 = vld [vmem:[#allocation2 + $0x78] sm:$0xff] }
 0x364   : > { %2427 = vst [vmem:[%s4041_s2 + $0x10] sm:$0xff] %v2363_v37  ;;  %v2364_v25 = vadd.f32 %v4214_v56, %v2288_v23  ;;  %v2396_v43 = vadd.f32 %v4214_v56, %v2320_v26  ;;  %v2289_v52 = vadd.f32 %v2225_v28, %v2072_v42  ;;  %v2321_v55 = vadd.f32 %v2257_v33, %v2152_v46  ;;  %v2233_v37 = vld [vmem:[#allocation2 + $0x120] sm:$0xff] }
 0x365   : > { %2459 = vst [vmem:[%s4041_s2 + $0x110] sm:$0xff] %v2395_v20  ;;  %v2074_v60 = vpop.f32.mrf.mxu0  ;;  %v2154_v0 = vpop.f32.mrf.mxu1  ;;  %v2265_v20 = vld [vmem:[#allocation2 + $0x70] sm:$0xff] }
 0x366   : > { %2428 = vst [vmem:[%s4041_s2 + $0x18] sm:$0xff] %v2364_v25  ;;  %2460 = vst [vmem:[%s4041_s2 + $0x118] sm:$0xff] %v2396_v43  ;;  %v2365_v35 = vadd.f32 %v4212_v50, %v2289_v52  ;;  %v2397_v7 = vadd.f32 %v4212_v50, %v2321_v55  ;;  %v2290_v13 = vadd.f32 %v2226_v51, %v2074_v60  ;;  %v2234_v25 = vld [vmem:[#allocation2 + $0x150] sm:$0xff] }
 0x367   : > { %v2322_v21 = vadd.f32 %v2258_v31, %v2154_v0  ;;  %v2076_v63 = vpop.f32.mrf.mxu0  ;;  %v2156_v12 = vpop.f32.mrf.mxu1  ;;  %v2266_v43 = vld [vmem:[#allocation2 + $0x90] sm:$0xff] }
 0x368   : > { %2429 = vst [vmem:[%s4041_s2 + $0x20] sm:$0xff] %v2365_v35  ;;  %2461 = vst [vmem:[%s4041_s2 + $0x120] sm:$0xff] %v2397_v7  ;;  %v2366_v34 = vadd.f32 %v4214_v56, %v2290_v13  ;;  %v2291_v38 = vadd.f32 %v2227_v29, %v2076_v63  ;;  %v2323_v41 = vadd.f32 %v2259_v32, %v2156_v12  ;;  %v2235_v35 = vld [vmem:[#allocation2 + $0x108] sm:$0xff]  ;;  %v2267_v7 = vld [vmem:[#allocation2 + $0x1d8] sm:$0xff] }
 0x369   : > { %v2398_v40 = vadd.f32 %v4214_v56, %v2322_v21  ;;  %v2078_v44 = vpop.f32.mrf.mxu0  ;;  %v2158_v57 = vpop.f32.mrf.mxu1 }
 0x36a   : > { %2430 = vst [vmem:[%s4041_s2 + $0x28] sm:$0xff] %v2366_v34  ;;  %v2367_v61 = vadd.f32 %v4212_v50, %v2291_v38  ;;  %v2399_v3 = vadd.f32 %v4212_v50, %v2323_v41  ;;  %v2292_v18 = vadd.f32 %v2228_v45, %v2078_v44  ;;  %v2324_v47 = vadd.f32 %v2260_v27, %v2158_v57  ;;  %v2236_v34 = vld [vmem:[#allocation2 + $0x60] sm:$0xff] }
 0x36b   : > { %2462 = vst [vmem:[%s4041_s2 + $0x128] sm:$0xff] %v2398_v40  ;;  %v2082_v53 = vpop.f32.mrf.mxu0  ;;  %v2162_v2 = vpop.f32.mrf.mxu1  ;;  %v2268_v40 = vld [vmem:[#allocation2 + $0xd0] sm:$0xff] }
 0x36c   : > { %2431 = vst [vmem:[%s4041_s2 + $0x30] sm:$0xff] %v2367_v61  ;;  %2463 = vst [vmem:[%s4041_s2 + $0x130] sm:$0xff] %v2399_v3  ;;  %v2368_v5 = vadd.f32 %v4214_v56, %v2292_v18  ;;  %v2400_v8 = vadd.f32 %v4214_v56, %v2324_v47  ;;  %v2293_v59 = vadd.f32 %v2229_v48, %v2082_v53  ;;  %v2237_v61 = vld [vmem:[#allocation2 + $0xe0] sm:$0xff]  ;;  %v2269_v3 = vld [vmem:[#allocation2 + $0xb8] sm:$0xff] }
 0x36d   : > { %v2325_v62 = vadd.f32 %v2261_v54, %v2162_v2  ;;  %v2084_v39 = vpop.f32.mrf.mxu0  ;;  %v2164_v49 = vpop.f32.mrf.mxu1 }
 0x36e   : > { %2432 = vst [vmem:[%s4041_s2 + $0x38] sm:$0xff] %v2368_v5  ;;  %2464 = vst [vmem:[%s4041_s2 + $0x138] sm:$0xff] %v2400_v8  ;;  %v2369_v6 = vadd.f32 %v4212_v50, %v2293_v59  ;;  %v2294_v11 = vadd.f32 %v2230_v4, %v2084_v39  ;;  %v2326_v14 = vadd.f32 %v2262_v16, %v2164_v49  ;;  %v2238_v5 = vld [vmem:[#allocation2 + $0x188] sm:$0xff] }
 0x36f   : > { %v2401_v10 = vadd.f32 %v4212_v50, %v2325_v62  ;;  %v2086_v17 = vpop.f32.mrf.mxu0  ;;  %v2166_v15 = vpop.f32.mrf.mxu1  ;;  %v2270_v8 = vld [vmem:[#allocation2 + $0x88] sm:$0xff] }
 0x370   : > { %2433 = vst [vmem:[%s4041_s2 + $0x40] sm:$0xff] %v2369_v6  ;;  %v2370_v24 = vadd.f32 %v4214_v56, %v2294_v11  ;;  %v2402_v9 = vadd.f32 %v4214_v56, %v2326_v14  ;;  %v2295_v22 = vadd.f32 %v2231_v58, %v2086_v17  ;;  %v2327_v36 = vadd.f32 %v2263_v1, %v2166_v15  ;;  %v2239_v6 = vld [vmem:[#allocation2 + $0x138] sm:$0xff] }
 0x371   : > { %2465 = vst [vmem:[%s4041_s2 + $0x140] sm:$0xff] %v2401_v10  ;;  %v2088_v28 = vpop.f32.mrf.mxu0  ;;  %v2168_v33 = vpop.f32.mrf.mxu1  ;;  %v2271_v10 = vld [vmem:[#allocation2 + $0xa8] sm:$0xff] }
 0x372   : > { %2434 = vst [vmem:[%s4041_s2 + $0x48] sm:$0xff] %v2370_v24  ;;  %2466 = vst [vmem:[%s4041_s2 + $0x148] sm:$0xff] %v2402_v9  ;;  %v2371_v23 = vadd.f32 %v4212_v50, %v2295_v22  ;;  %v2403_v26 = vadd.f32 %v4212_v50, %v2327_v36  ;;  %v2296_v42 = vadd.f32 %v2232_v19, %v2088_v28  ;;  %v2240_v24 = vld [vmem:[#allocation2 + $0x140] sm:$0xff]  ;;  %v2272_v9 = vld [vmem:[#allocation2 + $0x1c8] sm:$0xff] }
 0x373   : > { %v2328_v46 = vadd.f32 %v2264_v30, %v2168_v33  ;;  %v2092_v51 = vpop.f32.mrf.mxu0  ;;  %v2172_v31 = vpop.f32.mrf.mxu1 }
 0x374   : > { %2435 = vst [vmem:[%s4041_s2 + $0x50] sm:$0xff] %v2371_v23  ;;  %2467 = vst [vmem:[%s4041_s2 + $0x150] sm:$0xff] %v2403_v26  ;;  %v2372_v52 = vadd.f32 %v4214_v56, %v2296_v42  ;;  %v2297_v60 = vadd.f32 %v2233_v37, %v2092_v51  ;;  %v2329_v0 = vadd.f32 %v2265_v20, %v2172_v31  ;;  %v2241_v23 = vld [vmem:[#allocation2 + $0x80] sm:$0xff]  ;;  %v2273_v26 = vld [vmem:[#allocation2 + $0x170] sm:$0xff] }
 0x375   : > { %v2404_v55 = vadd.f32 %v4214_v56, %v2328_v46  ;;  %v2094_v29 = vpop.f32.mrf.mxu0  ;;  %v2174_v32 = vpop.f32.mrf.mxu1 }
 0x376   : > { %2436 = vst [vmem:[%s4041_s2 + $0x58] sm:$0xff] %v2372_v52  ;;  %v2373_v13 = vadd.f32 %v4212_v50, %v2297_v60  ;;  %v2405_v21 = vadd.f32 %v4212_v50, %v2329_v0  ;;  %v2298_v63 = vadd.f32 %v2234_v25, %v2094_v29  ;;  %v2330_v12 = vadd.f32 %v2266_v43, %v2174_v32  ;;  %v2242_v52 = vld [vmem:[#allocation2 + $0x1a8] sm:$0xff] }
 0x377   : > { %2468 = vst [vmem:[%s4041_s2 + $0x158] sm:$0xff] %v2404_v55  ;;  %v2096_v45 = vpop.f32.mrf.mxu0  ;;  %v2176_v27 = vpop.f32.mrf.mxu1  ;;  %v2274_v55 = vld [vmem:[#allocation2 + $0x178] sm:$0xff] }
 0x378   : > { %2437 = vst [vmem:[%s4041_s2 + $0x60] sm:$0xff] %v2373_v13  ;;  %2469 = vst [vmem:[%s4041_s2 + $0x160] sm:$0xff] %v2405_v21  ;;  %v2374_v38 = vadd.f32 %v4214_v56, %v2298_v63  ;;  %v2406_v41 = vadd.f32 %v4214_v56, %v2330_v12  ;;  %v2299_v44 = vadd.f32 %v2235_v35, %v2096_v45  ;;  %v2243_v13 = vld [vmem:[#allocation2 + $0x1b8] sm:$0xff]  ;;  %v2275_v21 = vld [vmem:[#allocation2 + $0x68] sm:$0xff] }
 0x379   : > { %v2331_v57 = vadd.f32 %v2267_v7, %v2176_v27  ;;  %v2098_v48 = vpop.f32.mrf.mxu0  ;;  %v2178_v54 = vpop.f32.mrf.mxu1 }
 0x37a   : > { %2438 = vst [vmem:[%s4041_s2 + $0x68] sm:$0xff] %v2374_v38  ;;  %2470 = vst [vmem:[%s4041_s2 + $0x168] sm:$0xff] %v2406_v41  ;;  %v2375_v18 = vadd.f32 %v4212_v50, %v2299_v44  ;;  %v2300_v53 = vadd.f32 %v2236_v34, %v2098_v48  ;;  %v2332_v2 = vadd.f32 %v2268_v40, %v2178_v54  ;;  %v2244_v38 = vld [vmem:[#allocation2 + $0x28] sm:$0xff]  ;;  %v2276_v41 = vld [vmem:[#allocation2 + $0x190] sm:$0xff] }
 0x37b   : > { %v2407_v47 = vadd.f32 %v4212_v50, %v2331_v57  ;;  %v2102_v4 = vpop.f32.mrf.mxu0  ;;  %v2182_v16 = vpop.f32.mrf.mxu1 }
 0x37c   : > { %2439 = vst [vmem:[%s4041_s2 + $0x70] sm:$0xff] %v2375_v18  ;;  %v2376_v59 = vadd.f32 %v4214_v56, %v2300_v53  ;;  %v2408_v62 = vadd.f32 %v4214_v56, %v2332_v2  ;;  %v2301_v39 = vadd.f32 %v2237_v61, %v2102_v4  ;;  %v2333_v49 = vadd.f32 %v2269_v3, %v2182_v16  ;;  %v2245_v18 = vld [vmem:[#allocation2 + $0x1e8] sm:$0xff] }
 0x37d   : > { %2471 = vst [vmem:[%s4041_s2 + $0x170] sm:$0xff] %v2407_v47  ;;  %v2104_v58 = vpop.f32.mrf.mxu0  ;;  %v2184_v1 = vpop.f32.mrf.mxu1  ;;  %v2277_v47 = vld [vmem:[#allocation2 + $0x198] sm:$0xff] }
 0x37e   : > { %2440 = vst [vmem:[%s4041_s2 + $0x78] sm:$0xff] %v2376_v59  ;;  %2472 = vst [vmem:[%s4041_s2 + $0x178] sm:$0xff] %v2408_v62  ;;  %v2377_v11 = vadd.f32 %v4212_v50, %v2301_v39  ;;  %v2409_v14 = vadd.f32 %v4212_v50, %v2333_v49  ;;  %v2302_v17 = vadd.f32 %v2238_v5, %v2104_v58  ;;  %v2246_v59 = vld [vmem:[#allocation2 + $0xf8] sm:$0xff] }
 0x37f   : > { %v2334_v15 = vadd.f32 %v2270_v8, %v2184_v1  ;;  %v2106_v19 = vpop.f32.mrf.mxu0  ;;  %v2186_v30 = vpop.f32.mrf.mxu1  ;;  %v2278_v62 = vld [vmem:[#allocation2 + $0x38] sm:$0xff] }
 0x380   : > { %2441 = vst [vmem:[%s4041_s2 + $0x80] sm:$0xff] %v2377_v11  ;;  %2473 = vst [vmem:[%s4041_s2 + $0x180] sm:$0xff] %v2409_v14  ;;  %v2378_v22 = vadd.f32 %v4214_v56, %v2302_v17  ;;  %v2303_v28 = vadd.f32 %v2239_v6, %v2106_v19  ;;  %v2335_v33 = vadd.f32 %v2271_v10, %v2186_v30  ;;  %v2247_v11 = vld [vmem:[#allocation2 + $0x160] sm:$0xff] }
 0x381   : > { %v2410_v36 = vadd.f32 %v4214_v56, %v2334_v15  ;;  %v2108_v37 = vpop.f32.mrf.mxu0  ;;  %v2188_v20 = vpop.f32.mrf.mxu1  ;;  %v2279_v14 = vld [vmem:[#allocation2 + $0xc0] sm:$0xff] }
 0x382   : > { %2442 = vst [vmem:[%s4041_s2 + $0x88] sm:$0xff] %v2378_v22  ;;  %v2379_v42 = vadd.f32 %v4212_v50, %v2303_v28  ;;  %v2411_v46 = vadd.f32 %v4212_v50, %v2335_v33  ;;  %v2304_v51 = vadd.f32 %v2240_v24, %v2108_v37  ;;  %v2336_v31 = vadd.f32 %v2272_v9, %v2188_v20  ;;  %v2248_v22 = vld [vmem:[#allocation2 + $0x30] sm:$0xff] }
 0x383   : > { %2474 = vst [vmem:[%s4041_s2 + $0x188] sm:$0xff] %v2410_v36  ;;  %v2112_v25 = vpop.f32.mrf.mxu0  ;;  %v2192_v43 = vpop.f32.mrf.mxu1  ;;  %v2280_v36 = vld [vmem:[#allocation2 + $0x1c0] sm:$0xff] }
 0x384   : > { %2443 = vst [vmem:[%s4041_s2 + $0x90] sm:$0xff] %v2379_v42  ;;  %2475 = vst [vmem:[%s4041_s2 + $0x190] sm:$0xff] %v2411_v46  ;;  %v2380_v60 = vadd.f32 %v4214_v56, %v2304_v51  ;;  %v2412_v0 = vadd.f32 %v4214_v56, %v2336_v31  ;;  %v2305_v29 = vadd.f32 %v2241_v23, %v2112_v25  ;;  %v2249_v42 = vld [vmem:[#allocation2 + $0x1e0] sm:$0xff]  ;;  %v2281_v46 = vld [vmem:[#allocation2 + $0x158] sm:$0xff] }
 0x385   : > { %v2337_v32 = vadd.f32 %v2273_v26, %v2192_v43  ;;  %v2114_v35 = vpop.f32.mrf.mxu0  ;;  %v2194_v7 = vpop.f32.mrf.mxu1 }
 0x386   : > { %2444 = vst [vmem:[%s4041_s2 + $0x98] sm:$0xff] %v2380_v60  ;;  %2476 = vst [vmem:[%s4041_s2 + $0x198] sm:$0xff] %v2412_v0  ;;  %v2381_v63 = vadd.f32 %v4212_v50, %v2305_v29  ;;  %v2306_v45 = vadd.f32 %v2242_v52, %v2114_v35  ;;  %v2338_v27 = vadd.f32 %v2274_v55, %v2194_v7  ;;  %v2250_v60 = vld [vmem:[#allocation2] sm:$0xff]  ;;  %v2282_v0 = vld [vmem:[#allocation2 + $0x10] sm:$0xff] }
 0x387   : > { %v2413_v12 = vadd.f32 %v4212_v50, %v2337_v32  ;;  %v2116_v34 = vpop.f32.mrf.mxu0  ;;  %v2196_v40 = vpop.f32.mrf.mxu1 }
 0x388   : > { %2445 = vst [vmem:[%s4041_s2 + $0xa0] sm:$0xff] %v2381_v63  ;;  %v2382_v44 = vadd.f32 %v4214_v56, %v2306_v45  ;;  %v2414_v57 = vadd.f32 %v4214_v56, %v2338_v27  ;;  %v2307_v48 = vadd.f32 %v2243_v13, %v2116_v34  ;;  %v2339_v54 = vadd.f32 %v2275_v21, %v2196_v40  ;;  %v2251_v63 = vld [vmem:[#allocation2 + $0xf0] sm:$0xff] }
 0x389   : > { %2477 = vst [vmem:[%s4041_s2 + $0x1a0] sm:$0xff] %v2413_v12  ;;  %v2118_v61 = vpop.f32.mrf.mxu0  ;;  %v2198_v3 = vpop.f32.mrf.mxu1  ;;  %v2283_v12 = vld [vmem:[#allocation2 + $0x58] sm:$0xff] }
 0x38a   : > { %2446 = vst [vmem:[%s4041_s2 + $0xa8] sm:$0xff] %v2382_v44  ;;  %2478 = vst [vmem:[%s4041_s2 + $0x1a8] sm:$0xff] %v2414_v57  ;;  %v2383_v53 = vadd.f32 %v4212_v50, %v2307_v48  ;;  %v2415_v2 = vadd.f32 %v4212_v50, %v2339_v54  ;;  %v2308_v4 = vadd.f32 %v2244_v38, %v2118_v61  ;;  %v2252_v44 = vld [vmem:[#allocation2 + $0x8] sm:$0xff]  ;;  %v2284_v57 = vld [vmem:[#allocation2 + $0xa0] sm:$0xff] }
 0x38b   : > { %v2340_v16 = vadd.f32 %v2276_v41, %v2198_v3  ;;  %v2122_v5 = vpop.f32.mrf.mxu0  ;;  %v2202_v8 = vpop.f32.mrf.mxu1 }
 0x38c   : > { %2447 = vst [vmem:[%s4041_s2 + $0xb0] sm:$0xff] %v2383_v53  ;;  %2479 = vst [vmem:[%s4041_s2 + $0x1b0] sm:$0xff] %v2415_v2  ;;  %v2384_v39 = vadd.f32 %v4214_v56, %v2308_v4  ;;  %v2309_v58 = vadd.f32 %v2245_v18, %v2122_v5  ;;  %v2341_v1 = vadd.f32 %v2277_v47, %v2202_v8 }
 0x38d   : > { %v2416_v49 = vadd.f32 %v4214_v56, %v2340_v16  ;;  %v2124_v6 = vpop.f32.mrf.mxu0  ;;  %v2204_v10 = vpop.f32.mrf.mxu1 }
 0x38e   : > { %2448 = vst [vmem:[%s4041_s2 + $0xb8] sm:$0xff] %v2384_v39  ;;  %v2385_v17 = vadd.f32 %v4212_v50, %v2309_v58  ;;  %v2417_v15 = vadd.f32 %v4212_v50, %v2341_v1  ;;  %v2310_v19 = vadd.f32 %v2246_v59, %v2124_v6  ;;  %v2342_v30 = vadd.f32 %v2278_v62, %v2204_v10 }
 0x38f   : > { %2480 = vst [vmem:[%s4041_s2 + $0x1b8] sm:$0xff] %v2416_v49  ;;  %v2126_v24 = vpop.f32.mrf.mxu0  ;;  %v2206_v9 = vpop.f32.mrf.mxu1 }
 0x390   : > { %2449 = vst [vmem:[%s4041_s2 + $0xc0] sm:$0xff] %v2385_v17  ;;  %2481 = vst [vmem:[%s4041_s2 + $0x1c0] sm:$0xff] %v2417_v15  ;;  %v2386_v28 = vadd.f32 %v4214_v56, %v2310_v19  ;;  %v2418_v33 = vadd.f32 %v4214_v56, %v2342_v30  ;;  %v2311_v37 = vadd.f32 %v2247_v11, %v2126_v24 }
 0x391   : > { %v2343_v20 = vadd.f32 %v2279_v14, %v2206_v9  ;;  %v2128_v23 = vpop.f32.mrf.mxu0  ;;  %v2208_v26 = vpop.f32.mrf.mxu1 }
 0x392   : > { %2450 = vst [vmem:[%s4041_s2 + $0xc8] sm:$0xff] %v2386_v28  ;;  %2482 = vst [vmem:[%s4041_s2 + $0x1c8] sm:$0xff] %v2418_v33  ;;  %v2387_v51 = vadd.f32 %v4212_v50, %v2311_v37  ;;  %v2312_v25 = vadd.f32 %v2248_v22, %v2128_v23  ;;  %v2344_v43 = vadd.f32 %v2280_v36, %v2208_v26 }
 0x393   : > { %v2419_v31 = vadd.f32 %v4212_v50, %v2343_v20  ;;  %v2132_v52 = vpop.f32.mrf.mxu0  ;;  %v2212_v55 = vpop.f32.mrf.mxu1 }
 0x394   : > { %2451 = vst [vmem:[%s4041_s2 + $0xd0] sm:$0xff] %v2387_v51  ;;  %v2388_v29 = vadd.f32 %v4214_v56, %v2312_v25  ;;  %v2420_v32 = vadd.f32 %v4214_v56, %v2344_v43  ;;  %v2313_v35 = vadd.f32 %v2249_v42, %v2132_v52  ;;  %v2345_v7 = vadd.f32 %v2281_v46, %v2212_v55 }
 0x395   : > { %2483 = vst [vmem:[%s4041_s2 + $0x1d0] sm:$0xff] %v2419_v31  ;;  %v2134_v13 = vpop.f32.mrf.mxu0  ;;  %v2214_v21 = vpop.f32.mrf.mxu1 }
 0x396   : > { %2452 = vst [vmem:[%s4041_s2 + $0xd8] sm:$0xff] %v2388_v29  ;;  %2484 = vst [vmem:[%s4041_s2 + $0x1d8] sm:$0xff] %v2420_v32  ;;  %v2389_v45 = vadd.f32 %v4212_v50, %v2313_v35  ;;  %v2421_v27 = vadd.f32 %v4212_v50, %v2345_v7  ;;  %v2314_v34 = vadd.f32 %v2250_v60, %v2134_v13 }
 0x397   : > { %v2346_v40 = vadd.f32 %v2282_v0, %v2214_v21  ;;  %v2136_v38 = vpop.f32.mrf.mxu0  ;;  %v2216_v41 = vpop.f32.mrf.mxu1 }
 0x398   : > { %2453 = vst [vmem:[%s4041_s2 + $0xe0] sm:$0xff] %v2389_v45  ;;  %2485 = vst [vmem:[%s4041_s2 + $0x1e0] sm:$0xff] %v2421_v27  ;;  %v2390_v48 = vadd.f32 %v4214_v56, %v2314_v34  ;;  %v2315_v61 = vadd.f32 %v2251_v63, %v2136_v38  ;;  %v2347_v3 = vadd.f32 %v2283_v12, %v2216_v41 }
 0x399   : > { %v2422_v54 = vadd.f32 %v4214_v56, %v2346_v40  ;;  %v2138_v18 = vpop.f32.mrf.mxu0  ;;  %v2218_v47 = vpop.f32.mrf.mxu1 }
 0x39a   : > { %2454 = vst [vmem:[%s4041_s2 + $0xe8] sm:$0xff] %v2390_v48  ;;  %v2391_v53 = vadd.f32 %v4212_v50, %v2315_v61  ;;  %v2423_v2 = vadd.f32 %v4212_v50, %v2347_v3  ;;  %v2316_v4 = vadd.f32 %v2252_v44, %v2138_v18  ;;  %v2348_v16 = vadd.f32 %v2284_v57, %v2218_v47 }
 0x39b   : > { %2486 = vst [vmem:[%s4041_s2 + $0x1e8] sm:$0xff] %v2422_v54 }
 0x39c   : > { %2455 = vst [vmem:[%s4041_s2 + $0xf0] sm:$0xff] %v2391_v53  ;;  %2487 = vst [vmem:[%s4041_s2 + $0x1f0] sm:$0xff] %v2423_v2  ;;  %v2392_v5 = vadd.f32 %v4214_v56, %v2316_v4  ;;  %v2424_v8 = vadd.f32 %v4214_v56, %v2348_v16 }
 0x39e   : > { %2456 = vst [vmem:[%s4041_s2 + $0xf8] sm:$0xff] %v2392_v5  ;;  %2488 = vst [vmem:[%s4041_s2 + $0x1f8] sm:$0xff] %v2424_v8 }
 0x39f PF: > { %s4554_s1 = sld [smem:[#allocation17_spill]]  ;;  %s2506_s5 = sshll.u32 %s4041_s2, 4  ;;  %s4347_s5 = int_to_ptr.vmem [resolvable:$true] %s2506_s5 }
 0x3a0   : > { %s4555_s3 = sld [smem:[#allocation44_spill]]  ;;  %s4356_s20 = scalar_lea.sflag [#allocation7], %s389_s19 }
 0x3a1   : > { %s3293_s4 = scalar_lea.vmem %s4347_s5, 8192  ;;  %p4556_p10 = scmp.ne.s32.totalorder %s4493_s17, 0 }
 0x3a2   : > { %p3294_p6 = scmp.ne.s32.totalorder %s4347_s5, %s3293_s4 }
 0x3a4   : > { %p3295_p3 = pnand %p3294_p6, %p4556_p10 }
 0x3a5   : > { %s2872_s0 = sshll.u32 %s4554_s1, 7 }
 0x3a6   : > { %s2503_s26 = sadd.s32 %s2872_s0, %s3757_s29  ;;  %p3296_p5 = pneg %p3295_p3 }
 0x3a7   : > { %s2867_s16 = sshll.u32 %s2503_s26, 7  ;;  %s3465_s29 = smov [#allocation10]  }
 0x3a8   : > { %s4352_s21 = scalar_lea.hbm %s4555_s3, %s2867_s16  ;;  %s3297_s2 = sshll.u32 %s3465_s29, 4  ;;  %s3298_s2 = int_to_ptr.vmem [resolvable:$false] %s3297_s2 }
 0x3a9   : > { %s3299_s22 = scalar_lea.vmem %s3298_s2, 16384  ;;  %p3300_p4 = scmp.lt.s32.totalorder %s4347_s5, %s3298_s2 }
 0x3aa   : > { %p3301_p11 = scmp.lt.s32.totalorder %s3299_s22, %s3293_s4 }
 0x3ac   : > { %p3302_p12 = por %p3301_p11, %p3300_p4 }
 0x3ae   : > { %p3303_p9 = pnand %p3302_p12, %p3296_p5 }
 0x3b0   : > { %3306 = shalt.err (!%p3303_p9)
}
 0x3b1   : > { %s3307_s19 = scalar_lea.hbm %s4352_s21, 8192  ;;  %s3311_s18 = scalar_lea.hbm %s4555_s3, 32768 }
 0x3b2   : > { %p3308_p7 = scmp.ne.s32.totalorder %s4352_s21, %s3307_s19  ;;  %p3312_p0 = scmp.lt.s32.totalorder %s4352_s21, %s4555_s3 }
 0x3b3   : > { %p3313_p2 = scmp.lt.s32.totalorder %s3311_s18, %s3307_s19 }
 0x3b4   : > { %p3309_p8 = pnand %p3308_p7, %p4556_p10 }
 0x3b5   : > { %p3314_p13 = por %p3313_p2, %p3312_p0 }
 0x3b6   : > { %p3310_p1 = pneg %p3309_p8 }
 0x3b8   : > { %p3315_p6 = pnand %p3314_p13, %p3310_p1 }
 0x3ba   : > { %3318 = shalt.err (!%p3315_p6)
}
 0x3bb   : > { %s3466_s26 = smov 256   ;;  %s3467_s16 = smov 512  }
 0x3bc   : > { %s3468_s8 = smov 16  }
 0x3bd   : > { %2879 = dma.vmem_to_hbm [thread:$0]  (%p4556_p10), %s4347_s5, 8192, %s4352_s21, %s4356_s20, %s3466_s26, %s3467_s16, %s3468_s8  }
 0x3be PF: > { %p2893_p3 = scmp.ge.s32.totalorder %s3457_s13, 2  ;;  %s2521_s7 = sand.u32 1, %s3397_s23  }
 0x3bf   : > { %p4557_p5 = scmp.ne.s32.totalorder %s4495_s14, 0  ;;  %s2522_s4 = scalar_lea.sflag [#allocation7], %s2521_s7 }
 0x3c1   : > { %p2889_p4 = pnand %p2893_p3, %p4557_p5 }
 0x3c3   : > { %p2890_p11 = pneg %p2889_p4 }
 0x3c5   : > { %3392 = dma.done.wait (%p2890_p11), %s2522_s4, 8192  }
 0x3c6   : > { %3394 = vsyncadd (%p2890_p11), %s2522_s4, 4294959104  ;;  %s26_s13 = sadd.s32 1, %s3457_s13   ;;  %s4559_s17 = sld [smem:[#allocation14_spill]] }
 0x3c7   : > { %p4384_p12 = scmp.ge.s32.totalorder %s26_s13, 10   ;;  %s4560_s8 = sld [smem:[#allocation18_spill]] }
 0x3c8   : > { %s4561_s14 = sld [smem:[#allocation19_spill]]  ;;  %s4565_s23 = smov %s3401_s24 }
 0x3c9   : > { %s4562_s5 = sld [smem:[#allocation20_spill]]  ;;  %s4567_s24 = smov %s3405_s25 }
 0x3ca   : > { %s4563_s11 = sld [smem:[#allocation22_spill]]  ;;  %s4568_s25 = smov %s3712_s15 }
 0x3cb   : > { %s4564_s12 = sld [smem:[#allocation23_spill]]  ;;  %s4569_s26 = smov %s3413_s27 }
 0x3cc   : > { %s4570_s27 = smov %s3417_s28  ;;  %s4571_s28 = smov %s3693_s6 }
 0x3cd   : > { %s4572_s29 = smov %s4559_s17  ;;  %s4573_s0 = smov %s3429_s30 }
 0x3ce   : > { %s4574_s30 = smov %s3709_s9  ;;  %s4575_s7 = smov %s3445_s10 }
 0x3cf   : > { %s4576_s9 = smov %s4561_s14  ;;  %s4577_s10 = smov %s4562_s5 }
 0x3d0   :  { %25 = sbr.rel (!%p4384_p12) target bundleno = 21 (0x15), region = 119 }
 0x3d5   :  { %2527 = vsyncpa [#allocation6], 1 }
 0x3d6   :  { %2529 = vsyncpa [#allocation6 + $0x1], 1 }
 0x3d7   :  { %2530 = vsyncpa [#allocation9], 1 }
 0x3d8   :  { %2532 = vsyncpa [#allocation9 + $0x1], 1 }
 0x3d9   :  { %2533 = vsyncpa [#allocation7], 1 }
 0x3da   :  { %2535 = vsyncpa [#allocation7 + $0x1], 1 }

</bundles_post_ra>
